<compile_context>
chip_gen: v7x
topology: tpu7x:2x2x1
jax: 0.10.0
libtpu: 0.0.40
codegen_flags: <defaults>
</compile_context>

<pallas_src>
import jax
import jax.numpy as jnp
from jax.experimental import pallas as pl
from jax.experimental.pallas import tpu as pltpu

# ---------------- small synthetic config (scaled-down albert-base-v2) -------
VOCAB = 50
MAX_POS = 16
EMBED = 16           # albert embedding_size (128 in the real model)
HIDDEN = 32          # 768 in the real model
NUM_HEADS = 4        # 12
HEAD_DIM = HIDDEN // NUM_HEADS
INTERMEDIATE = 64    # 3072
NUM_LAYERS = 2       # 12 (weights shared across layers, ALBERT-style)
MLP_HIDDEN = 16      # 100 in the real head
LN_EPS = 1e-12
NEG_INF = -1e9


# --------------------------- in-kernel helpers -------------------------------
def _gelu_tanh(x):
    # gelu_new / tanh approximation, f32 elementwise (EUP tanh).
    c = 0.7978845608028654  # sqrt(2/pi)
    return 0.5 * x * (1.0 + jnp.tanh(c * (x + 0.044715 * x * x * x)))


def _layernorm(x, g, b):
    mean = jnp.mean(x, axis=-1, keepdims=True)
    cen = x - mean
    var = jnp.mean(cen * cen, axis=-1, keepdims=True)
    inv = jax.lax.rsqrt(var + LN_EPS)
    return cen * inv * g + b


def _mm(x, w_bf16):
    """bf16 MXU matmul with f32 accumulation.  x: f32 [M,K], w: bf16 [K,N]."""
    return jnp.dot(x.astype(jnp.bfloat16), w_bf16,
                   preferred_element_type=jnp.float32)


# ------------------------------ fused kernel ---------------------------------
def _fused_albert_kernel(
        emb_ref, mask_ref,
        emb_ln_g_ref, emb_ln_b_ref,
        emb_proj_w_ref, emb_proj_b_ref,
        qkv_w_ref, qkv_b_ref,
        ao_w_ref, ao_b_ref,
        ln1_g_ref, ln1_b_ref,
        ff1_w_ref, ff1_b_ref,
        ff2_w_ref, ff2_b_ref,
        ln2_g_ref, ln2_b_ref,
        mlp1_w_ref, mlp1_b_ref,
        mlp2_w_ref, mlp2_b_ref,
        cls_ref, out_ref):
    B, _, S = mask_ref.shape

    # --- embeddings: LayerNorm + projection to HIDDEN ---
    h = _layernorm(emb_ref[...], emb_ln_g_ref[...], emb_ln_b_ref[...])
    h = _mm(h, emb_proj_w_ref[...]) + emb_proj_b_ref[...]          # [B*S, H] f32

    # --- additive attention mask, [B, 1, S]: broadcasts over the query dim ---
    addmask = (1.0 - mask_ref[...]) * NEG_INF

    # Shared ALBERT weights, loaded once and live in vregs/VMEM across layers.
    qkv_w, qkv_b = qkv_w_ref[...], qkv_b_ref[...]
    ao_w, ao_b = ao_w_ref[...], ao_b_ref[...]
    ln1_g, ln1_b = ln1_g_ref[...], ln1_b_ref[...]
    ff1_w, ff1_b = ff1_w_ref[...], ff1_b_ref[...]
    ff2_w, ff2_b = ff2_w_ref[...], ff2_b_ref[...]
    ln2_g, ln2_b = ln2_g_ref[...], ln2_b_ref[...]

    def layer(_, h):
        # ---- fused Q/K/V projection (scale pre-folded into the Q columns) ----
        qkv = _mm(h, qkv_w) + qkv_b                                # [B*S, 3H] f32
        # Sublane-only split [B*S, 3H] -> [B, S, 3H]; cast MXU operands to bf16.
        qkv3 = qkv.reshape(B, S, 3 * HIDDEN).astype(jnp.bfloat16)

        # ---- attention: per head, two contractions batched over B ----
        heads = []
        for hd in range(NUM_HEADS):
            q_h = qkv3[:, :, hd * HEAD_DIM:(hd + 1) * HEAD_DIM]            # [B,S,Dh]
            k_h = qkv3[:, :, HIDDEN + hd * HEAD_DIM:
                             HIDDEN + (hd + 1) * HEAD_DIM]
            v_h = qkv3[:, :, 2 * HIDDEN + hd * HEAD_DIM:
                             2 * HIDDEN + (hd + 1) * HEAD_DIM]
            s = jnp.einsum('bqd,bkd->bqk', q_h, k_h,
                           preferred_element_type=jnp.float32)             # [B,S,S]
            s = s + addmask                                                # mask keys
            m = jnp.max(s, axis=-1, keepdims=True)
            p = jnp.exp(s - m)
            p = p * pl.reciprocal(jnp.sum(p, axis=-1, keepdims=True),
                                  approx=True)                             # EUP slot
            heads.append(jnp.einsum('bqk,bkd->bqd', p.astype(jnp.bfloat16),
                                    v_h, preferred_element_type=jnp.float32))
        ctx = jnp.concatenate(heads, axis=-1).reshape(B * S, HIDDEN)       # f32

        attn_out = _mm(ctx, ao_w) + ao_b
        h = _layernorm(h + attn_out, ln1_g, ln1_b)

        ff = _gelu_tanh(_mm(h, ff1_w) + ff1_b)
        ff = _mm(ff, ff2_w) + ff2_b
        return _layernorm(h + ff, ln2_g, ln2_b)

    # ALBERT: one parameter set reused across layers -> simple fori_loop carry.
    h = jax.lax.fori_loop(0, NUM_LAYERS, layer, h)

    # ---- CLS rows (token 0 of each sequence) + MLP regression head ----
    cls = h.reshape(B, S, HIDDEN)[:, 0, :]                         # [B, HIDDEN]
    cls_ref[...] = cls

    hid = _gelu_tanh(_mm(cls, mlp1_w_ref[...]) + mlp1_b_ref[...])
    # final projection to one scalar per row (N=1): plain f32 matmul
    out_ref[...] = (jnp.dot(hid, mlp2_w_ref[...],
                            preferred_element_type=jnp.float32)
                    + mlp2_b_ref[...])                             # [B, 1]


# ----------------------------- model glue ------------------------------------
def init_params(key):
    """Parameters with MXU weights pre-cast to bf16 and QKV pre-fused/pre-scaled
    (one-time weight transforms, so the per-call wrapper does no weight work)."""
    keys = iter(jax.random.split(key, 16))

    def w(shape, scale=0.02):
        return jax.random.normal(next(keys), shape, jnp.float32) * scale

    zeros = lambda s: jnp.zeros(s, jnp.float32)
    ones = lambda s: jnp.ones(s, jnp.float32)
    bf16 = lambda x: x.astype(jnp.bfloat16)

    attn_scale = 1.0 / (HEAD_DIM ** 0.5)
    q_w, k_w, v_w = w((HIDDEN, HIDDEN)), w((HIDDEN, HIDDEN)), w((HIDDEN, HIDDEN))
    q_b, k_b, v_b = zeros((1, HIDDEN)), zeros((1, HIDDEN)), zeros((1, HIDDEN))

    return {
        # embeddings (gathered in plain JAX)
        "word_emb": w((VOCAB, EMBED)),
        "pos_emb": w((MAX_POS, EMBED)),
        "tok_emb": w((2, EMBED)),
        "emb_ln_g": ones((1, EMBED)), "emb_ln_b": zeros((1, EMBED)),
        "emb_proj_w": bf16(w((EMBED, HIDDEN))), "emb_proj_b": zeros((1, HIDDEN)),
        # shared ALBERT encoder layer; 1/sqrt(Dh) folded into Q columns
        "qkv_w": bf16(jnp.concatenate([q_w * attn_scale, k_w, v_w], axis=1)),
        "qkv_b": jnp.concatenate([q_b * attn_scale, k_b, v_b], axis=1),
        "ao_w": bf16(w((HIDDEN, HIDDEN))), "ao_b": zeros((1, HIDDEN)),
        "ln1_g": ones((1, HIDDEN)), "ln1_b": zeros((1, HIDDEN)),
        "ff1_w": bf16(w((HIDDEN, INTERMEDIATE))), "ff1_b": zeros((1, INTERMEDIATE)),
        "ff2_w": bf16(w((INTERMEDIATE, HIDDEN))), "ff2_b": zeros((1, HIDDEN)),
        "ln2_g": ones((1, HIDDEN)), "ln2_b": zeros((1, HIDDEN)),
        # MLP regression head: Linear(H, MLP_HIDDEN) -> GELU -> Linear(MLP_HIDDEN, 1)
        "mlp1_w": bf16(w((HIDDEN, MLP_HIDDEN))), "mlp1_b": zeros((1, MLP_HIDDEN)),
        "mlp2_w": w((MLP_HIDDEN, 1)), "mlp2_b": zeros((1, 1)),
    }


def _vmem_spec(shape):
    ndim = len(shape)
    return pl.BlockSpec(shape, lambda i, _n=ndim: (0,) * _n)


def custom_bert_regressor_forward(params, input_ids, mask):
    """Returns (cls, out) matching the PyTorch module's forward."""
    B, S = input_ids.shape

    # Embedding-table gathers are plain-JAX glue; everything downstream runs
    # inside ONE fused Pallas kernel.
    we = params["word_emb"][input_ids]                 # [B, S, E]
    pe = params["pos_emb"][:S][None, :, :]             # [1, S, E]
    te = params["tok_emb"][0][None, None, :]           # token_type_ids == 0
    emb = (we + pe + te).reshape(B * S, EMBED)

    mask_f = mask.astype(jnp.float32).reshape(B, 1, S)  # [B, 1, S]

    inputs = (
        emb, mask_f,
        params["emb_ln_g"], params["emb_ln_b"],
        params["emb_proj_w"], params["emb_proj_b"],
        params["qkv_w"], params["qkv_b"],
        params["ao_w"], params["ao_b"],
        params["ln1_g"], params["ln1_b"],
        params["ff1_w"], params["ff1_b"],
        params["ff2_w"], params["ff2_b"],
        params["ln2_g"], params["ln2_b"],
        params["mlp1_w"], params["mlp1_b"],
        params["mlp2_w"], params["mlp2_b"],
    )

    cls, out = pl.pallas_call(
        _fused_albert_kernel,
        grid=(1,),
        in_specs=[_vmem_spec(x.shape) for x in inputs],
        out_specs=(_vmem_spec((B, HIDDEN)), _vmem_spec((B, 1))),
        out_shape=(jax.ShapeDtypeStruct((B, HIDDEN), jnp.float32),
                   jax.ShapeDtypeStruct((B, 1), jnp.float32)),
        compiler_params=pltpu.CompilerParams(
            dimension_semantics=("arbitrary",)),
    )(*inputs)
    return cls, out


if __name__ == "__main__":
    key = jax.random.PRNGKey(0)
    k_param, k_ids = jax.random.split(key)

    params = init_params(k_param)

    B, S = 2, 8
    input_ids = jax.random.randint(k_ids, (B, S), 0, VOCAB, dtype=jnp.int32)
    mask = jnp.ones((B, S), jnp.int32).at[1, 6:].set(0)   # pad last 2 of row 1

    fwd = jax.jit(custom_bert_regressor_forward)
    cls, out = fwd(params, input_ids, mask)
    jax.block_until_ready((cls, out))

    assert cls.shape == (B, HIDDEN) and out.shape == (B, 1)
    assert bool(jnp.all(jnp.isfinite(cls))) and bool(jnp.all(jnp.isfinite(out)))
    print("KERNEL_OK")
</pallas_src>

<mosaic_0001>
module attributes {stable_mosaic.version = 11 : i64} {
  func.func @_fused_albert_kernel(%arg0: i32, %arg1: memref<16x16xf32, #tpu.memory_space<vmem>>, %arg2: memref<2x1x8xf32, #tpu.memory_space<vmem>>, %arg3: memref<1x16xf32, #tpu.memory_space<vmem>>, %arg4: memref<1x16xf32, #tpu.memory_space<vmem>>, %arg5: memref<16x32xbf16, #tpu.memory_space<vmem>>, %arg6: memref<1x32xf32, #tpu.memory_space<vmem>>, %arg7: memref<32x96xbf16, #tpu.memory_space<vmem>>, %arg8: memref<1x96xf32, #tpu.memory_space<vmem>>, %arg9: memref<32x32xbf16, #tpu.memory_space<vmem>>, %arg10: memref<1x32xf32, #tpu.memory_space<vmem>>, %arg11: memref<1x32xf32, #tpu.memory_space<vmem>>, %arg12: memref<1x32xf32, #tpu.memory_space<vmem>>, %arg13: memref<32x64xbf16, #tpu.memory_space<vmem>>, %arg14: memref<1x64xf32, #tpu.memory_space<vmem>>, %arg15: memref<64x32xbf16, #tpu.memory_space<vmem>>, %arg16: memref<1x32xf32, #tpu.memory_space<vmem>>, %arg17: memref<1x32xf32, #tpu.memory_space<vmem>>, %arg18: memref<1x32xf32, #tpu.memory_space<vmem>>, %arg19: memref<32x16xbf16, #tpu.memory_space<vmem>>, %arg20: memref<1x16xf32, #tpu.memory_space<vmem>>, %arg21: memref<16x1xf32, #tpu.memory_space<vmem>>, %arg22: memref<1x1xf32, #tpu.memory_space<vmem>>, %arg23: memref<2x32xf32, #tpu.memory_space<vmem>>, %arg24: memref<2x1xf32, #tpu.memory_space<vmem>>) attributes {dimension_semantics = [#tpu.dimension_semantics<arbitrary>], iteration_bounds = array<i64: 1>, scalar_prefetch = 0 : i64, scratch_operands = 0 : i64, tpu.core_type = #tpu.core_type<tc>, window_params = [{pipeline_mode = #tpu.pipeline_mode<synchronous>, transform_indices = @transform_0, window_bounds = array<i64: 16, 16>}, {pipeline_mode = #tpu.pipeline_mode<synchronous>, transform_indices = @transform_1, window_bounds = array<i64: 2, 1, 8>}, {pipeline_mode = #tpu.pipeline_mode<synchronous>, transform_indices = @transform_2, window_bounds = array<i64: 1, 16>}, {pipeline_mode = #tpu.pipeline_mode<synchronous>, transform_indices = @transform_3, window_bounds = array<i64: 1, 16>}, {pipeline_mode = #tpu.pipeline_mode<synchronous>, transform_indices = @transform_4, window_bounds = array<i64: 16, 32>}, {pipeline_mode = #tpu.pipeline_mode<synchronous>, transform_indices = @transform_5, window_bounds = array<i64: 1, 32>}, {pipeline_mode = #tpu.pipeline_mode<synchronous>, transform_indices = @transform_6, window_bounds = array<i64: 32, 96>}, {pipeline_mode = #tpu.pipeline_mode<synchronous>, transform_indices = @transform_7, window_bounds = array<i64: 1, 96>}, {pipeline_mode = #tpu.pipeline_mode<synchronous>, transform_indices = @transform_8, window_bounds = array<i64: 32, 32>}, {pipeline_mode = #tpu.pipeline_mode<synchronous>, transform_indices = @transform_9, window_bounds = array<i64: 1, 32>}, {pipeline_mode = #tpu.pipeline_mode<synchronous>, transform_indices = @transform_10, window_bounds = array<i64: 1, 32>}, {pipeline_mode = #tpu.pipeline_mode<synchronous>, transform_indices = @transform_11, window_bounds = array<i64: 1, 32>}, {pipeline_mode = #tpu.pipeline_mode<synchronous>, transform_indices = @transform_12, window_bounds = array<i64: 32, 64>}, {pipeline_mode = #tpu.pipeline_mode<synchronous>, transform_indices = @transform_13, window_bounds = array<i64: 1, 64>}, {pipeline_mode = #tpu.pipeline_mode<synchronous>, transform_indices = @transform_14, window_bounds = array<i64: 64, 32>}, {pipeline_mode = #tpu.pipeline_mode<synchronous>, transform_indices = @transform_15, window_bounds = array<i64: 1, 32>}, {pipeline_mode = #tpu.pipeline_mode<synchronous>, transform_indices = @transform_16, window_bounds = array<i64: 1, 32>}, {pipeline_mode = #tpu.pipeline_mode<synchronous>, transform_indices = @transform_17, window_bounds = array<i64: 1, 32>}, {pipeline_mode = #tpu.pipeline_mode<synchronous>, transform_indices = @transform_18, window_bounds = array<i64: 32, 16>}, {pipeline_mode = #tpu.pipeline_mode<synchronous>, transform_indices = @transform_19, window_bounds = array<i64: 1, 16>}, {pipeline_mode = #tpu.pipeline_mode<synchronous>, transform_indices = @transform_20, window_bounds = array<i64: 16, 1>}, {pipeline_mode = #tpu.pipeline_mode<synchronous>, transform_indices = @transform_21, window_bounds = array<i64: 1, 1>}, {pipeline_mode = #tpu.pipeline_mode<synchronous>, transform_indices = @transform_22, window_bounds = array<i64: 2, 32>}, {pipeline_mode = #tpu.pipeline_mode<synchronous>, transform_indices = @transform_23, window_bounds = array<i64: 2, 1>}]} {
    %c0 = arith.constant 0 : index
    %c0_0 = arith.constant 0 : index
    %0 = vector.load %arg1[%c0, %c0_0] : memref<16x16xf32, #tpu.memory_space<vmem>>, vector<16x16xf32>
    %c0_1 = arith.constant 0 : index
    %c0_2 = arith.constant 0 : index
    %1 = vector.load %arg3[%c0_1, %c0_2] : memref<1x16xf32, #tpu.memory_space<vmem>>, vector<1x16xf32>
    %c0_3 = arith.constant 0 : index
    %c0_4 = arith.constant 0 : index
    %2 = vector.load %arg4[%c0_3, %c0_4] : memref<1x16xf32, #tpu.memory_space<vmem>>, vector<1x16xf32>
    %cst = arith.constant dense<0.000000e+00> : vector<16xf32>
    %3 = vector.multi_reduction <add>, %0, %cst [1] : vector<16x16xf32> to vector<16xf32>
    %4 = vector.shape_cast %3 : vector<16xf32> to vector<16x1xf32>
    %cst_5 = arith.constant 1.600000e+01 : f32
    %5 = vector.broadcast %cst_5 : f32 to vector<16x1xf32>
    %6 = arith.divf %4, %5 : vector<16x1xf32>
    %7 = vector.broadcast %6 : vector<16x1xf32> to vector<16x16xf32>
    %8 = arith.subf %0, %7 : vector<16x16xf32>
    %9 = arith.mulf %8, %8 : vector<16x16xf32>
    %cst_6 = arith.constant dense<0.000000e+00> : vector<16xf32>
    %10 = vector.multi_reduction <add>, %9, %cst_6 [1] : vector<16x16xf32> to vector<16xf32>
    %11 = vector.shape_cast %10 : vector<16xf32> to vector<16x1xf32>
    %cst_7 = arith.constant 1.600000e+01 : f32
    %12 = vector.broadcast %cst_7 : f32 to vector<16x1xf32>
    %13 = arith.divf %11, %12 : vector<16x1xf32>
    %cst_8 = arith.constant 9.99999996E-13 : f32
    %14 = vector.broadcast %cst_8 : f32 to vector<16x1xf32>
    %15 = arith.addf %13, %14 : vector<16x1xf32>
    %16 = math.rsqrt %15 : vector<16x1xf32>
    %17 = vector.broadcast %16 : vector<16x1xf32> to vector<16x16xf32>
    %18 = arith.mulf %8, %17 : vector<16x16xf32>
    %19 = vector.broadcast %1 : vector<1x16xf32> to vector<16x16xf32>
    %20 = arith.mulf %18, %19 : vector<16x16xf32>
    %21 = vector.broadcast %2 : vector<1x16xf32> to vector<16x16xf32>
    %22 = arith.addf %20, %21 : vector<16x16xf32>
    %c0_9 = arith.constant 0 : index
    %c0_10 = arith.constant 0 : index
    %23 = vector.load %arg5[%c0_9, %c0_10] : memref<16x32xbf16, #tpu.memory_space<vmem>>, vector<16x32xbf16>
    %24 = arith.truncf %22 : vector<16x16xf32> to vector<16x16xbf16>
    %cst_11 = arith.constant dense<0.000000e+00> : vector<16x32xf32>
    %25 = tpu.matmul %24, %23, %cst_11 {dimension_numbers = #tpu.dot_dimension_numbers<[1], [0], [0], [1], [0, 0, 1, 1], [], []>} : vector<16x16xbf16>, vector<16x32xbf16>, vector<16x32xf32> -> vector<16x32xf32>
    %c0_12 = arith.constant 0 : index
    %c0_13 = arith.constant 0 : index
    %26 = vector.load %arg6[%c0_12, %c0_13] : memref<1x32xf32, #tpu.memory_space<vmem>>, vector<1x32xf32>
    %27 = vector.broadcast %26 : vector<1x32xf32> to vector<16x32xf32>
    %28 = arith.addf %25, %27 : vector<16x32xf32>
    %c0_14 = arith.constant 0 : index
    %c0_15 = arith.constant 0 : index
    %c0_16 = arith.constant 0 : index
    %29 = vector.load %arg2[%c0_14, %c0_15, %c0_16] : memref<2x1x8xf32, #tpu.memory_space<vmem>>, vector<2x1x8xf32>
    %cst_17 = arith.constant 1.000000e+00 : f32
    %30 = vector.broadcast %cst_17 : f32 to vector<2x1x8xf32>
    %31 = arith.subf %30, %29 : vector<2x1x8xf32>
    %cst_18 = arith.constant -1.000000e+09 : f32
    %32 = vector.broadcast %cst_18 : f32 to vector<2x1x8xf32>
    %33 = arith.mulf %31, %32 : vector<2x1x8xf32>
    %c0_19 = arith.constant 0 : index
    %c0_20 = arith.constant 0 : index
    %34 = vector.load %arg7[%c0_19, %c0_20] : memref<32x96xbf16, #tpu.memory_space<vmem>>, vector<32x96xbf16>
    %c0_21 = arith.constant 0 : index
    %c0_22 = arith.constant 0 : index
    %35 = vector.load %arg8[%c0_21, %c0_22] : memref<1x96xf32, #tpu.memory_space<vmem>>, vector<1x96xf32>
    %c0_23 = arith.constant 0 : index
    %c0_24 = arith.constant 0 : index
    %36 = vector.load %arg9[%c0_23, %c0_24] : memref<32x32xbf16, #tpu.memory_space<vmem>>, vector<32x32xbf16>
    %c0_25 = arith.constant 0 : index
    %c0_26 = arith.constant 0 : index
    %37 = vector.load %arg10[%c0_25, %c0_26] : memref<1x32xf32, #tpu.memory_space<vmem>>, vector<1x32xf32>
    %c0_27 = arith.constant 0 : index
    %c0_28 = arith.constant 0 : index
    %38 = vector.load %arg11[%c0_27, %c0_28] : memref<1x32xf32, #tpu.memory_space<vmem>>, vector<1x32xf32>
    %c0_29 = arith.constant 0 : index
    %c0_30 = arith.constant 0 : index
    %39 = vector.load %arg12[%c0_29, %c0_30] : memref<1x32xf32, #tpu.memory_space<vmem>>, vector<1x32xf32>
    %c0_31 = arith.constant 0 : index
    %c0_32 = arith.constant 0 : index
    %40 = vector.load %arg13[%c0_31, %c0_32] : memref<32x64xbf16, #tpu.memory_space<vmem>>, vector<32x64xbf16>
    %c0_33 = arith.constant 0 : index
    %c0_34 = arith.constant 0 : index
    %41 = vector.load %arg14[%c0_33, %c0_34] : memref<1x64xf32, #tpu.memory_space<vmem>>, vector<1x64xf32>
    %c0_35 = arith.constant 0 : index
    %c0_36 = arith.constant 0 : index
    %42 = vector.load %arg15[%c0_35, %c0_36] : memref<64x32xbf16, #tpu.memory_space<vmem>>, vector<64x32xbf16>
    %c0_37 = arith.constant 0 : index
    %c0_38 = arith.constant 0 : index
    %43 = vector.load %arg16[%c0_37, %c0_38] : memref<1x32xf32, #tpu.memory_space<vmem>>, vector<1x32xf32>
    %c0_39 = arith.constant 0 : index
    %c0_40 = arith.constant 0 : index
    %44 = vector.load %arg17[%c0_39, %c0_40] : memref<1x32xf32, #tpu.memory_space<vmem>>, vector<1x32xf32>
    %c0_41 = arith.constant 0 : index
    %c0_42 = arith.constant 0 : index
    %45 = vector.load %arg18[%c0_41, %c0_42] : memref<1x32xf32, #tpu.memory_space<vmem>>, vector<1x32xf32>
    %c0_i32 = arith.constant 0 : i32
    %c2_i32 = arith.constant 2 : i32
    %46 = arith.addi %c0_i32, %c2_i32 : i32
    %c1_i32 = arith.constant 1 : i32
    %47 = scf.for %arg25 = %c0_i32 to %46 step %c1_i32 iter_args(%arg26 = %28) -> (vector<16x32xf32>)  : i32 {
      %77 = arith.truncf %arg26 : vector<16x32xf32> to vector<16x32xbf16>
      %cst_61 = arith.constant dense<0.000000e+00> : vector<16x96xf32>
      %78 = tpu.matmul %77, %34, %cst_61 {dimension_numbers = #tpu.dot_dimension_numbers<[1], [0], [0], [1], [0, 0, 1, 1], [], []>} : vector<16x32xbf16>, vector<32x96xbf16>, vector<16x96xf32> -> vector<16x96xf32>
      %79 = vector.broadcast %35 : vector<1x96xf32> to vector<16x96xf32>
      %80 = arith.addf %78, %79 : vector<16x96xf32>
      %81 = vector.shape_cast %80 : vector<16x96xf32> to vector<2x8x96xf32>
      %82 = arith.truncf %81 : vector<2x8x96xf32> to vector<2x8x96xbf16>
      %83 = vector.extract_strided_slice %82 {offsets = [0, 0, 0], sizes = [2, 8, 8], strides = [1, 1, 1]} : vector<2x8x96xbf16> to vector<2x8x8xbf16>
      %84 = vector.extract_strided_slice %82 {offsets = [0, 0, 32], sizes = [2, 8, 8], strides = [1, 1, 1]} : vector<2x8x96xbf16> to vector<2x8x8xbf16>
      %85 = vector.extract_strided_slice %82 {offsets = [0, 0, 64], sizes = [2, 8, 8], strides = [1, 1, 1]} : vector<2x8x96xbf16> to vector<2x8x8xbf16>
      "tpu.trace_start"() <{level = 10 : i32, message = "bqd,bkd->bqk"}> : () -> ()
      %cst_62 = arith.constant dense<0.000000e+00> : vector<2x8x8xf32>
      %86 = tpu.matmul %83, %84, %cst_62 {dimension_numbers = #tpu.dot_dimension_numbers<[2], [2], [1], [1], [0, 0, 0, 1, 1, 1], [0], [0]>} : vector<2x8x8xbf16>, vector<2x8x8xbf16>, vector<2x8x8xf32> -> vector<2x8x8xf32>
      "tpu.trace_stop"() : () -> ()
      %87 = vector.broadcast %33 : vector<2x1x8xf32> to vector<2x8x8xf32>
      %88 = arith.addf %86, %87 : vector<2x8x8xf32>
      %cst_63 = arith.constant dense<0xFF800000> : vector<2x8xf32>
      %89 = vector.multi_reduction <maximumf>, %88, %cst_63 [2] : vector<2x8x8xf32> to vector<2x8xf32>
      %90 = vector.shape_cast %89 : vector<2x8xf32> to vector<2x8x1xf32>
      %91 = vector.broadcast %90 : vector<2x8x1xf32> to vector<2x8x8xf32>
      %92 = arith.subf %88, %91 : vector<2x8x8xf32>
      %93 = math.exp %92 : vector<2x8x8xf32>
      %cst_64 = arith.constant dense<0.000000e+00> : vector<2x8xf32>
      %94 = vector.multi_reduction <add>, %93, %cst_64 [2] : vector<2x8x8xf32> to vector<2x8xf32>
      %95 = vector.shape_cast %94 : vector<2x8xf32> to vector<2x8x1xf32>
      %96 = tpu.reciprocal %95 {approx = true} : vector<2x8x1xf32> -> vector<2x8x1xf32>
      %97 = vector.broadcast %96 : vector<2x8x1xf32> to vector<2x8x8xf32>
      %98 = arith.mulf %93, %97 : vector<2x8x8xf32>
      %99 = arith.truncf %98 : vector<2x8x8xf32> to vector<2x8x8xbf16>
      "tpu.trace_start"() <{level = 10 : i32, message = "bqk,bkd->bqd"}> : () -> ()
      %cst_65 = arith.constant dense<0.000000e+00> : vector<2x8x8xf32>
      %100 = tpu.matmul %99, %85, %cst_65 {dimension_numbers = #tpu.dot_dimension_numbers<[2], [1], [1], [2], [0, 0, 0, 1, 1, 2], [0], [0]>} : vector<2x8x8xbf16>, vector<2x8x8xbf16>, vector<2x8x8xf32> -> vector<2x8x8xf32>
      "tpu.trace_stop"() : () -> ()
      %101 = vector.extract_strided_slice %82 {offsets = [0, 0, 8], sizes = [2, 8, 8], strides = [1, 1, 1]} : vector<2x8x96xbf16> to vector<2x8x8xbf16>
      %102 = vector.extract_strided_slice %82 {offsets = [0, 0, 40], sizes = [2, 8, 8], strides = [1, 1, 1]} : vector<2x8x96xbf16> to vector<2x8x8xbf16>
      %103 = vector.extract_strided_slice %82 {offsets = [0, 0, 72], sizes = [2, 8, 8], strides = [1, 1, 1]} : vector<2x8x96xbf16> to vector<2x8x8xbf16>
      "tpu.trace_start"() <{level = 10 : i32, message = "bqd,bkd->bqk"}> : () -> ()
      %cst_66 = arith.constant dense<0.000000e+00> : vector<2x8x8xf32>
      %104 = tpu.matmul %101, %102, %cst_66 {dimension_numbers = #tpu.dot_dimension_numbers<[2], [2], [1], [1], [0, 0, 0, 1, 1, 1], [0], [0]>} : vector<2x8x8xbf16>, vector<2x8x8xbf16>, vector<2x8x8xf32> -> vector<2x8x8xf32>
      "tpu.trace_stop"() : () -> ()
      %105 = vector.broadcast %33 : vector<2x1x8xf32> to vector<2x8x8xf32>
      %106 = arith.addf %104, %105 : vector<2x8x8xf32>
      %cst_67 = arith.constant dense<0xFF800000> : vector<2x8xf32>
      %107 = vector.multi_reduction <maximumf>, %106, %cst_67 [2] : vector<2x8x8xf32> to vector<2x8xf32>
      %108 = vector.shape_cast %107 : vector<2x8xf32> to vector<2x8x1xf32>
      %109 = vector.broadcast %108 : vector<2x8x1xf32> to vector<2x8x8xf32>
      %110 = arith.subf %106, %109 : vector<2x8x8xf32>
      %111 = math.exp %110 : vector<2x8x8xf32>
      %cst_68 = arith.constant dense<0.000000e+00> : vector<2x8xf32>
      %112 = vector.multi_reduction <add>, %111, %cst_68 [2] : vector<2x8x8xf32> to vector<2x8xf32>
      %113 = vector.shape_cast %112 : vector<2x8xf32> to vector<2x8x1xf32>
      %114 = tpu.reciprocal %113 {approx = true} : vector<2x8x1xf32> -> vector<2x8x1xf32>
      %115 = vector.broadcast %114 : vector<2x8x1xf32> to vector<2x8x8xf32>
      %116 = arith.mulf %111, %115 : vector<2x8x8xf32>
      %117 = arith.truncf %116 : vector<2x8x8xf32> to vector<2x8x8xbf16>
      "tpu.trace_start"() <{level = 10 : i32, message = "bqk,bkd->bqd"}> : () -> ()
      %cst_69 = arith.constant dense<0.000000e+00> : vector<2x8x8xf32>
      %118 = tpu.matmul %117, %103, %cst_69 {dimension_numbers = #tpu.dot_dimension_numbers<[2], [1], [1], [2], [0, 0, 0, 1, 1, 2], [0], [0]>} : vector<2x8x8xbf16>, vector<2x8x8xbf16>, vector<2x8x8xf32> -> vector<2x8x8xf32>
      "tpu.trace_stop"() : () -> ()
      %119 = vector.extract_strided_slice %82 {offsets = [0, 0, 16], sizes = [2, 8, 8], strides = [1, 1, 1]} : vector<2x8x96xbf16> to vector<2x8x8xbf16>
      %120 = vector.extract_strided_slice %82 {offsets = [0, 0, 48], sizes = [2, 8, 8], strides = [1, 1, 1]} : vector<2x8x96xbf16> to vector<2x8x8xbf16>
      %121 = vector.extract_strided_slice %82 {offsets = [0, 0, 80], sizes = [2, 8, 8], strides = [1, 1, 1]} : vector<2x8x96xbf16> to vector<2x8x8xbf16>
      "tpu.trace_start"() <{level = 10 : i32, message = "bqd,bkd->bqk"}> : () -> ()
      %cst_70 = arith.constant dense<0.000000e+00> : vector<2x8x8xf32>
      %122 = tpu.matmul %119, %120, %cst_70 {dimension_numbers = #tpu.dot_dimension_numbers<[2], [2], [1], [1], [0, 0, 0, 1, 1, 1], [0], [0]>} : vector<2x8x8xbf16>, vector<2x8x8xbf16>, vector<2x8x8xf32> -> vector<2x8x8xf32>
      "tpu.trace_stop"() : () -> ()
      %123 = vector.broadcast %33 : vector<2x1x8xf32> to vector<2x8x8xf32>
      %124 = arith.addf %122, %123 : vector<2x8x8xf32>
      %cst_71 = arith.constant dense<0xFF800000> : vector<2x8xf32>
      %125 = vector.multi_reduction <maximumf>, %124, %cst_71 [2] : vector<2x8x8xf32> to vector<2x8xf32>
      %126 = vector.shape_cast %125 : vector<2x8xf32> to vector<2x8x1xf32>
      %127 = vector.broadcast %126 : vector<2x8x1xf32> to vector<2x8x8xf32>
      %128 = arith.subf %124, %127 : vector<2x8x8xf32>
      %129 = math.exp %128 : vector<2x8x8xf32>
      %cst_72 = arith.constant dense<0.000000e+00> : vector<2x8xf32>
      %130 = vector.multi_reduction <add>, %129, %cst_72 [2] : vector<2x8x8xf32> to vector<2x8xf32>
      %131 = vector.shape_cast %130 : vector<2x8xf32> to vector<2x8x1xf32>
      %132 = tpu.reciprocal %131 {approx = true} : vector<2x8x1xf32> -> vector<2x8x1xf32>
      %133 = vector.broadcast %132 : vector<2x8x1xf32> to vector<2x8x8xf32>
      %134 = arith.mulf %129, %133 : vector<2x8x8xf32>
      %135 = arith.truncf %134 : vector<2x8x8xf32> to vector<2x8x8xbf16>
      "tpu.trace_start"() <{level = 10 : i32, message = "bqk,bkd->bqd"}> : () -> ()
      %cst_73 = arith.constant dense<0.000000e+00> : vector<2x8x8xf32>
      %136 = tpu.matmul %135, %121, %cst_73 {dimension_numbers = #tpu.dot_dimension_numbers<[2], [1], [1], [2], [0, 0, 0, 1, 1, 2], [0], [0]>} : vector<2x8x8xbf16>, vector<2x8x8xbf16>, vector<2x8x8xf32> -> vector<2x8x8xf32>
      "tpu.trace_stop"() : () -> ()
      %137 = vector.extract_strided_slice %82 {offsets = [0, 0, 24], sizes = [2, 8, 8], strides = [1, 1, 1]} : vector<2x8x96xbf16> to vector<2x8x8xbf16>
      %138 = vector.extract_strided_slice %82 {offsets = [0, 0, 56], sizes = [2, 8, 8], strides = [1, 1, 1]} : vector<2x8x96xbf16> to vector<2x8x8xbf16>
      %139 = vector.extract_strided_slice %82 {offsets = [0, 0, 88], sizes = [2, 8, 8], strides = [1, 1, 1]} : vector<2x8x96xbf16> to vector<2x8x8xbf16>
      "tpu.trace_start"() <{level = 10 : i32, message = "bqd,bkd->bqk"}> : () -> ()
      %cst_74 = arith.constant dense<0.000000e+00> : vector<2x8x8xf32>
      %140 = tpu.matmul %137, %138, %cst_74 {dimension_numbers = #tpu.dot_dimension_numbers<[2], [2], [1], [1], [0, 0, 0, 1, 1, 1], [0], [0]>} : vector<2x8x8xbf16>, vector<2x8x8xbf16>, vector<2x8x8xf32> -> vector<2x8x8xf32>
      "tpu.trace_stop"() : () -> ()
      %141 = vector.broadcast %33 : vector<2x1x8xf32> to vector<2x8x8xf32>
      %142 = arith.addf %140, %141 : vector<2x8x8xf32>
      %cst_75 = arith.constant dense<0xFF800000> : vector<2x8xf32>
      %143 = vector.multi_reduction <maximumf>, %142, %cst_75 [2] : vector<2x8x8xf32> to vector<2x8xf32>
      %144 = vector.shape_cast %143 : vector<2x8xf32> to vector<2x8x1xf32>
      %145 = vector.broadcast %144 : vector<2x8x1xf32> to vector<2x8x8xf32>
      %146 = arith.subf %142, %145 : vector<2x8x8xf32>
      %147 = math.exp %146 : vector<2x8x8xf32>
      %cst_76 = arith.constant dense<0.000000e+00> : vector<2x8xf32>
      %148 = vector.multi_reduction <add>, %147, %cst_76 [2] : vector<2x8x8xf32> to vector<2x8xf32>
      %149 = vector.shape_cast %148 : vector<2x8xf32> to vector<2x8x1xf32>
      %150 = tpu.reciprocal %149 {approx = true} : vector<2x8x1xf32> -> vector<2x8x1xf32>
      %151 = vector.broadcast %150 : vector<2x8x1xf32> to vector<2x8x8xf32>
      %152 = arith.mulf %147, %151 : vector<2x8x8xf32>
      %153 = arith.truncf %152 : vector<2x8x8xf32> to vector<2x8x8xbf16>
      "tpu.trace_start"() <{level = 10 : i32, message = "bqk,bkd->bqd"}> : () -> ()
      %cst_77 = arith.constant dense<0.000000e+00> : vector<2x8x8xf32>
      %154 = tpu.matmul %153, %139, %cst_77 {dimension_numbers = #tpu.dot_dimension_numbers<[2], [1], [1], [2], [0, 0, 0, 1, 1, 2], [0], [0]>} : vector<2x8x8xbf16>, vector<2x8x8xbf16>, vector<2x8x8xf32> -> vector<2x8x8xf32>
      "tpu.trace_stop"() : () -> ()
      %155 = tpu.concatenate %100, %118, %136, %154 in 2 : vector<2x8x8xf32>, vector<2x8x8xf32>, vector<2x8x8xf32>, vector<2x8x8xf32> -> vector<2x8x32xf32>
      %156 = vector.shape_cast %155 : vector<2x8x32xf32> to vector<16x32xf32>
      %157 = arith.truncf %156 : vector<16x32xf32> to vector<16x32xbf16>
      %cst_78 = arith.constant dense<0.000000e+00> : vector<16x32xf32>
      %158 = tpu.matmul %157, %36, %cst_78 {dimension_numbers = #tpu.dot_dimension_numbers<[1], [0], [0], [1], [0, 0, 1, 1], [], []>} : vector<16x32xbf16>, vector<32x32xbf16>, vector<16x32xf32> -> vector<16x32xf32>
      %159 = vector.broadcast %37 : vector<1x32xf32> to vector<16x32xf32>
      %160 = arith.addf %158, %159 : vector<16x32xf32>
      %161 = arith.addf %arg26, %160 : vector<16x32xf32>
      %cst_79 = arith.constant dense<0.000000e+00> : vector<16xf32>
      %162 = vector.multi_reduction <add>, %161, %cst_79 [1] : vector<16x32xf32> to vector<16xf32>
      %163 = vector.shape_cast %162 : vector<16xf32> to vector<16x1xf32>
      %cst_80 = arith.constant 3.200000e+01 : f32
      %164 = vector.broadcast %cst_80 : f32 to vector<16x1xf32>
      %165 = arith.divf %163, %164 : vector<16x1xf32>
      %166 = vector.broadcast %165 : vector<16x1xf32> to vector<16x32xf32>
      %167 = arith.subf %161, %166 : vector<16x32xf32>
      %168 = arith.mulf %167, %167 : vector<16x32xf32>
      %cst_81 = arith.constant dense<0.000000e+00> : vector<16xf32>
      %169 = vector.multi_reduction <add>, %168, %cst_81 [1] : vector<16x32xf32> to vector<16xf32>
      %170 = vector.shape_cast %169 : vector<16xf32> to vector<16x1xf32>
      %cst_82 = arith.constant 3.200000e+01 : f32
      %171 = vector.broadcast %cst_82 : f32 to vector<16x1xf32>
      %172 = arith.divf %170, %171 : vector<16x1xf32>
      %cst_83 = arith.constant 9.99999996E-13 : f32
      %173 = vector.broadcast %cst_83 : f32 to vector<16x1xf32>
      %174 = arith.addf %172, %173 : vector<16x1xf32>
      %175 = math.rsqrt %174 : vector<16x1xf32>
      %176 = vector.broadcast %175 : vector<16x1xf32> to vector<16x32xf32>
      %177 = arith.mulf %167, %176 : vector<16x32xf32>
      %178 = vector.broadcast %38 : vector<1x32xf32> to vector<16x32xf32>
      %179 = arith.mulf %177, %178 : vector<16x32xf32>
      %180 = vector.broadcast %39 : vector<1x32xf32> to vector<16x32xf32>
      %181 = arith.addf %179, %180 : vector<16x32xf32>
      %182 = arith.truncf %181 : vector<16x32xf32> to vector<16x32xbf16>
      %cst_84 = arith.constant dense<0.000000e+00> : vector<16x64xf32>
      %183 = tpu.matmul %182, %40, %cst_84 {dimension_numbers = #tpu.dot_dimension_numbers<[1], [0], [0], [1], [0, 0, 1, 1], [], []>} : vector<16x32xbf16>, vector<32x64xbf16>, vector<16x64xf32> -> vector<16x64xf32>
      %184 = vector.broadcast %41 : vector<1x64xf32> to vector<16x64xf32>
      %185 = arith.addf %183, %184 : vector<16x64xf32>
      %cst_85 = arith.constant 5.000000e-01 : f32
      %186 = vector.broadcast %cst_85 : f32 to vector<16x64xf32>
      %187 = arith.mulf %186, %185 : vector<16x64xf32>
      %cst_86 = arith.constant 4.471500e-02 : f32
      %188 = vector.broadcast %cst_86 : f32 to vector<16x64xf32>
      %189 = arith.mulf %188, %185 : vector<16x64xf32>
      %190 = arith.mulf %189, %185 : vector<16x64xf32>
      %191 = arith.mulf %190, %185 : vector<16x64xf32>
      %192 = arith.addf %185, %191 : vector<16x64xf32>
      %cst_87 = arith.constant 0.797884583 : f32
      %193 = vector.broadcast %cst_87 : f32 to vector<16x64xf32>
      %194 = arith.mulf %193, %192 : vector<16x64xf32>
      %195 = math.tanh %194 : vector<16x64xf32>
      %cst_88 = arith.constant 1.000000e+00 : f32
      %196 = vector.broadcast %cst_88 : f32 to vector<16x64xf32>
      %197 = arith.addf %196, %195 : vector<16x64xf32>
      %198 = arith.mulf %187, %197 : vector<16x64xf32>
      %199 = arith.truncf %198 : vector<16x64xf32> to vector<16x64xbf16>
      %cst_89 = arith.constant dense<0.000000e+00> : vector<16x32xf32>
      %200 = tpu.matmul %199, %42, %cst_89 {dimension_numbers = #tpu.dot_dimension_numbers<[1], [0], [0], [1], [0, 0, 1, 1], [], []>} : vector<16x64xbf16>, vector<64x32xbf16>, vector<16x32xf32> -> vector<16x32xf32>
      %201 = vector.broadcast %43 : vector<1x32xf32> to vector<16x32xf32>
      %202 = arith.addf %200, %201 : vector<16x32xf32>
      %203 = arith.addf %181, %202 : vector<16x32xf32>
      %cst_90 = arith.constant dense<0.000000e+00> : vector<16xf32>
      %204 = vector.multi_reduction <add>, %203, %cst_90 [1] : vector<16x32xf32> to vector<16xf32>
      %205 = vector.shape_cast %204 : vector<16xf32> to vector<16x1xf32>
      %cst_91 = arith.constant 3.200000e+01 : f32
      %206 = vector.broadcast %cst_91 : f32 to vector<16x1xf32>
      %207 = arith.divf %205, %206 : vector<16x1xf32>
      %208 = vector.broadcast %207 : vector<16x1xf32> to vector<16x32xf32>
      %209 = arith.subf %203, %208 : vector<16x32xf32>
      %210 = arith.mulf %209, %209 : vector<16x32xf32>
      %cst_92 = arith.constant dense<0.000000e+00> : vector<16xf32>
      %211 = vector.multi_reduction <add>, %210, %cst_92 [1] : vector<16x32xf32> to vector<16xf32>
      %212 = vector.shape_cast %211 : vector<16xf32> to vector<16x1xf32>
      %cst_93 = arith.constant 3.200000e+01 : f32
      %213 = vector.broadcast %cst_93 : f32 to vector<16x1xf32>
      %214 = arith.divf %212, %213 : vector<16x1xf32>
      %cst_94 = arith.constant 9.99999996E-13 : f32
      %215 = vector.broadcast %cst_94 : f32 to vector<16x1xf32>
      %216 = arith.addf %214, %215 : vector<16x1xf32>
      %217 = math.rsqrt %216 : vector<16x1xf32>
      %218 = vector.broadcast %217 : vector<16x1xf32> to vector<16x32xf32>
      %219 = arith.mulf %209, %218 : vector<16x32xf32>
      %220 = vector.broadcast %44 : vector<1x32xf32> to vector<16x32xf32>
      %221 = arith.mulf %219, %220 : vector<16x32xf32>
      %222 = vector.broadcast %45 : vector<1x32xf32> to vector<16x32xf32>
      %223 = arith.addf %221, %222 : vector<16x32xf32>
      scf.yield %223 : vector<16x32xf32>
    }
    %48 = vector.shape_cast %47 : vector<16x32xf32> to vector<2x8x32xf32>
    %49 = vector.extract_strided_slice %48 {offsets = [0, 0, 0], sizes = [2, 1, 32], strides = [1, 1, 1]} : vector<2x8x32xf32> to vector<2x1x32xf32>
    %50 = vector.shape_cast %49 : vector<2x1x32xf32> to vector<2x32xf32>
    %c0_43 = arith.constant 0 : index
    %c0_44 = arith.constant 0 : index
    %51 = vector.load %arg23[%c0_43, %c0_44] : memref<2x32xf32, #tpu.memory_space<vmem>>, vector<2x32xf32>
    tpu.vector_store %arg23[%c0_43, %c0_44], %50 {strides = array<i32>} : memref<2x32xf32, #tpu.memory_space<vmem>>, vector<2x32xf32>,
    %c0_45 = arith.constant 0 : index
    %c0_46 = arith.constant 0 : index
    %52 = vector.load %arg19[%c0_45, %c0_46] : memref<32x16xbf16, #tpu.memory_space<vmem>>, vector<32x16xbf16>
    %53 = arith.truncf %50 : vector<2x32xf32> to vector<2x32xbf16>
    %cst_47 = arith.constant dense<0.000000e+00> : vector<2x16xf32>
    %54 = tpu.matmul %53, %52, %cst_47 {dimension_numbers = #tpu.dot_dimension_numbers<[1], [0], [0], [1], [0, 0, 1, 1], [], []>} : vector<2x32xbf16>, vector<32x16xbf16>, vector<2x16xf32> -> vector<2x16xf32>
    %c0_48 = arith.constant 0 : index
    %c0_49 = arith.constant 0 : index
    %55 = vector.load %arg20[%c0_48, %c0_49] : memref<1x16xf32, #tpu.memory_space<vmem>>, vector<1x16xf32>
    %56 = vector.broadcast %55 : vector<1x16xf32> to vector<2x16xf32>
    %57 = arith.addf %54, %56 : vector<2x16xf32>
    %cst_50 = arith.constant 5.000000e-01 : f32
    %58 = vector.broadcast %cst_50 : f32 to vector<2x16xf32>
    %59 = arith.mulf %58, %57 : vector<2x16xf32>
    %cst_51 = arith.constant 4.471500e-02 : f32
    %60 = vector.broadcast %cst_51 : f32 to vector<2x16xf32>
    %61 = arith.mulf %60, %57 : vector<2x16xf32>
    %62 = arith.mulf %61, %57 : vector<2x16xf32>
    %63 = arith.mulf %62, %57 : vector<2x16xf32>
    %64 = arith.addf %57, %63 : vector<2x16xf32>
    %cst_52 = arith.constant 0.797884583 : f32
    %65 = vector.broadcast %cst_52 : f32 to vector<2x16xf32>
    %66 = arith.mulf %65, %64 : vector<2x16xf32>
    %67 = math.tanh %66 : vector<2x16xf32>
    %cst_53 = arith.constant 1.000000e+00 : f32
    %68 = vector.broadcast %cst_53 : f32 to vector<2x16xf32>
    %69 = arith.addf %68, %67 : vector<2x16xf32>
    %70 = arith.mulf %59, %69 : vector<2x16xf32>
    %c0_54 = arith.constant 0 : index
    %c0_55 = arith.constant 0 : index
    %71 = vector.load %arg21[%c0_54, %c0_55] : memref<16x1xf32, #tpu.memory_space<vmem>>, vector<16x1xf32>
    %cst_56 = arith.constant dense<0.000000e+00> : vector<2x1xf32>
    %72 = tpu.matmul %70, %71, %cst_56 {dimension_numbers = #tpu.dot_dimension_numbers<[1], [0], [0], [1], [0, 0, 1, 1], [], []>} : vector<2x16xf32>, vector<16x1xf32>, vector<2x1xf32> -> vector<2x1xf32>
    %c0_57 = arith.constant 0 : index
    %c0_58 = arith.constant 0 : index
    %73 = vector.load %arg22[%c0_57, %c0_58] : memref<1x1xf32, #tpu.memory_space<vmem>>, vector<1x1xf32>
    %74 = vector.broadcast %73 : vector<1x1xf32> to vector<2x1xf32>
    %75 = arith.addf %72, %74 : vector<2x1xf32>
    %c0_59 = arith.constant 0 : index
    %c0_60 = arith.constant 0 : index
    %76 = vector.load %arg24[%c0_59, %c0_60] : memref<2x1xf32, #tpu.memory_space<vmem>>, vector<2x1xf32>
    tpu.vector_store %arg24[%c0_59, %c0_60], %75 {strides = array<i32>} : memref<2x1xf32, #tpu.memory_space<vmem>>, vector<2x1xf32>,
    return
  }
  func.func @transform_0(%arg0: i32) -> (i32, i32) {
    %c0_i32 = arith.constant 0 : i32
    %c0_i32_0 = arith.constant 0 : i32
    %c0_i32_1 = arith.constant 0 : i32
    return %c0_i32, %c0_i32_0 : i32, i32
  }
  func.func @transform_1(%arg0: i32) -> (i32, i32, i32) {
    %c0_i32 = arith.constant 0 : i32
    %c0_i32_0 = arith.constant 0 : i32
    %c0_i32_1 = arith.constant 0 : i32
    %c0_i32_2 = arith.constant 0 : i32
    return %c0_i32, %c0_i32_0, %c0_i32_1 : i32, i32, i32
  }
  func.func @transform_2(%arg0: i32) -> (i32, i32) {
    %c0_i32 = arith.constant 0 : i32
    %c0_i32_0 = arith.constant 0 : i32
    %c0_i32_1 = arith.constant 0 : i32
    return %c0_i32, %c0_i32_0 : i32, i32
  }
  func.func @transform_3(%arg0: i32) -> (i32, i32) {
    %c0_i32 = arith.constant 0 : i32
    %c0_i32_0 = arith.constant 0 : i32
    %c0_i32_1 = arith.constant 0 : i32
    return %c0_i32, %c0_i32_0 : i32, i32
  }
  func.func @transform_4(%arg0: i32) -> (i32, i32) {
    %c0_i32 = arith.constant 0 : i32
    %c0_i32_0 = arith.constant 0 : i32
    %c0_i32_1 = arith.constant 0 : i32
    return %c0_i32, %c0_i32_0 : i32, i32
  }
  func.func @transform_5(%arg0: i32) -> (i32, i32) {
    %c0_i32 = arith.constant 0 : i32
    %c0_i32_0 = arith.constant 0 : i32
    %c0_i32_1 = arith.constant 0 : i32
    return %c0_i32, %c0_i32_0 : i32, i32
  }
  func.func @transform_6(%arg0: i32) -> (i32, i32) {
    %c0_i32 = arith.constant 0 : i32
    %c0_i32_0 = arith.constant 0 : i32
    %c0_i32_1 = arith.constant 0 : i32
    return %c0_i32, %c0_i32_0 : i32, i32
  }
  func.func @transform_7(%arg0: i32) -> (i32, i32) {
    %c0_i32 = arith.constant 0 : i32
    %c0_i32_0 = arith.constant 0 : i32
    %c0_i32_1 = arith.constant 0 : i32
    return %c0_i32, %c0_i32_0 : i32, i32
  }
  func.func @transform_8(%arg0: i32) -> (i32, i32) {
    %c0_i32 = arith.constant 0 : i32
    %c0_i32_0 = arith.constant 0 : i32
    %c0_i32_1 = arith.constant 0 : i32
    return %c0_i32, %c0_i32_0 : i32, i32
  }
  func.func @transform_9(%arg0: i32) -> (i32, i32) {
    %c0_i32 = arith.constant 0 : i32
    %c0_i32_0 = arith.constant 0 : i32
    %c0_i32_1 = arith.constant 0 : i32
    return %c0_i32, %c0_i32_0 : i32, i32
  }
  func.func @transform_10(%arg0: i32) -> (i32, i32) {
    %c0_i32 = arith.constant 0 : i32
    %c0_i32_0 = arith.constant 0 : i32
    %c0_i32_1 = arith.constant 0 : i32
    return %c0_i32, %c0_i32_0 : i32, i32
  }
  func.func @transform_11(%arg0: i32) -> (i32, i32) {
    %c0_i32 = arith.constant 0 : i32
    %c0_i32_0 = arith.constant 0 : i32
    %c0_i32_1 = arith.constant 0 : i32
    return %c0_i32, %c0_i32_0 : i32, i32
  }
  func.func @transform_12(%arg0: i32) -> (i32, i32) {
    %c0_i32 = arith.constant 0 : i32
    %c0_i32_0 = arith.constant 0 : i32
    %c0_i32_1 = arith.constant 0 : i32
    return %c0_i32, %c0_i32_0 : i32, i32
  }
  func.func @transform_13(%arg0: i32) -> (i32, i32) {
    %c0_i32 = arith.constant 0 : i32
    %c0_i32_0 = arith.constant 0 : i32
    %c0_i32_1 = arith.constant 0 : i32
    return %c0_i32, %c0_i32_0 : i32, i32
  }
  func.func @transform_14(%arg0: i32) -> (i32, i32) {
    %c0_i32 = arith.constant 0 : i32
    %c0_i32_0 = arith.constant 0 : i32
    %c0_i32_1 = arith.constant 0 : i32
    return %c0_i32, %c0_i32_0 : i32, i32
  }
  func.func @transform_15(%arg0: i32) -> (i32, i32) {
    %c0_i32 = arith.constant 0 : i32
    %c0_i32_0 = arith.constant 0 : i32
    %c0_i32_1 = arith.constant 0 : i32
    return %c0_i32, %c0_i32_0 : i32, i32
  }
  func.func @transform_16(%arg0: i32) -> (i32, i32) {
    %c0_i32 = arith.constant 0 : i32
    %c0_i32_0 = arith.constant 0 : i32
    %c0_i32_1 = arith.constant 0 : i32
    return %c0_i32, %c0_i32_0 : i32, i32
  }
  func.func @transform_17(%arg0: i32) -> (i32, i32) {
    %c0_i32 = arith.constant 0 : i32
    %c0_i32_0 = arith.constant 0 : i32
    %c0_i32_1 = arith.constant 0 : i32
    return %c0_i32, %c0_i32_0 : i32, i32
  }
  func.func @transform_18(%arg0: i32) -> (i32, i32) {
    %c0_i32 = arith.constant 0 : i32
    %c0_i32_0 = arith.constant 0 : i32
    %c0_i32_1 = arith.constant 0 : i32
    return %c0_i32, %c0_i32_0 : i32, i32
  }
  func.func @transform_19(%arg0: i32) -> (i32, i32) {
    %c0_i32 = arith.constant 0 : i32
    %c0_i32_0 = arith.constant 0 : i32
    %c0_i32_1 = arith.constant 0 : i32
    return %c0_i32, %c0_i32_0 : i32, i32
  }
  func.func @transform_20(%arg0: i32) -> (i32, i32) {
    %c0_i32 = arith.constant 0 : i32
    %c0_i32_0 = arith.constant 0 : i32
    %c0_i32_1 = arith.constant 0 : i32
    return %c0_i32, %c0_i32_0 : i32, i32
  }
  func.func @transform_21(%arg0: i32) -> (i32, i32) {
    %c0_i32 = arith.constant 0 : i32
    %c0_i32_0 = arith.constant 0 : i32
    %c0_i32_1 = arith.constant 0 : i32
    return %c0_i32, %c0_i32_0 : i32, i32
  }
  func.func @transform_22(%arg0: i32) -> (i32, i32) {
    %c0_i32 = arith.constant 0 : i32
    %c0_i32_0 = arith.constant 0 : i32
    %c0_i32_1 = arith.constant 0 : i32
    return %c0_i32, %c0_i32_0 : i32, i32
  }
  func.func @transform_23(%arg0: i32) -> (i32, i32) {
    %c0_i32 = arith.constant 0 : i32
    %c0_i32_0 = arith.constant 0 : i32
    %c0_i32_1 = arith.constant 0 : i32
    return %c0_i32, %c0_i32_0 : i32, i32
  }
}

</mosaic_0001>

<bundles_post_ra>
// kernel: custom_bert_regressor_forward.1
= control target key start
LH: loop header
LB: loop body
LE: loop exit
PB: predicated region body
PF: predicated region fallthrough
CT: control target
= control target key end

     0   :  { %s2757_s0 = inlined_call_operand.vmem [shape: f32[16,16], index: 0, kind: input, shape index: {}]   ;;  %s2758_s1 = inlined_call_operand.vmem [shape: f32[2,1,8], index: 1, kind: input, shape index: {}]   ;;  %s2759_s2 = inlined_call_operand.vmem [shape: f32[1,16], index: 2, kind: input, shape index: {}]   ;;  %s2760_s3 = inlined_call_operand.vmem [shape: f32[1,16], index: 3, kind: input, shape index: {}]   ;;  %s2761_s4 = inlined_call_operand.vmem [shape: bf16[16,32], index: 4, kind: input, shape index: {}]   ;;  %s2762_s5 = inlined_call_operand.vmem [shape: f32[1,32], index: 5, kind: input, shape index: {}]   ;;  %s2763_s6 = inlined_call_operand.vmem [shape: bf16[32,96], index: 6, kind: input, shape index: {}]   ;;  %s2764_s7 = inlined_call_operand.vmem [shape: f32[1,96], index: 7, kind: input, shape index: {}]   ;;  %s2765_s8 = inlined_call_operand.vmem [shape: bf16[32,32], index: 8, kind: input, shape index: {}]   ;;  %s2766_s9 = inlined_call_operand.vmem [shape: f32[1,32], index: 9, kind: input, shape index: {}]   ;;  %s2767_s10 = inlined_call_operand.vmem [shape: f32[1,32], index: 10, kind: input, shape index: {}]   ;;  %s2768_s11 = inlined_call_operand.vmem [shape: f32[1,32], index: 11, kind: input, shape index: {}]   ;;  %s2769_s12 = inlined_call_operand.vmem [shape: bf16[32,64], index: 12, kind: input, shape index: {}]   ;;  %s2770_s13 = inlined_call_operand.vmem [shape: f32[1,64], index: 13, kind: input, shape index: {}]   ;;  %s2771_s14 = inlined_call_operand.vmem [shape: bf16[64,32], index: 14, kind: input, shape index: {}]   ;;  %s2772_s15 = inlined_call_operand.vmem [shape: f32[1,32], index: 15, kind: input, shape index: {}]   ;;  %s2773_s16 = inlined_call_operand.vmem [shape: f32[1,32], index: 16, kind: input, shape index: {}]   ;;  %s2774_s17 = inlined_call_operand.vmem [shape: f32[1,32], index: 17, kind: input, shape index: {}]   ;;  %s2775_s18 = inlined_call_operand.vmem [shape: bf16[32,16], index: 18, kind: input, shape index: {}]   ;;  %s2776_s19 = inlined_call_operand.vmem [shape: f32[1,16], index: 19, kind: input, shape index: {}]   ;;  %s2777_s20 = inlined_call_operand.vmem [shape: f32[16,1], index: 20, kind: input, shape index: {}]   ;;  %s2778_s21 = inlined_call_operand.<no memory space> [shape: f32[1,1], index: 21, kind: input, shape index: {}]   ;;  %s2779_s22 = inlined_call_operand.hbm [shape: f32[2,32], index: 22, kind: output, shape index: {0}]   ;;  %s2780_s23 = inlined_call_operand.vmem [shape: f32[2,1], index: 23, kind: output, shape index: {1}]  }
   0x1   :  { %2784 = sst [smem:[#allocation6_spill]] %s2757_s0  ;;  %v29_v0 = vstv %s2778_s21 }
   0x2   :  { %2785 = sst [smem:[#allocation7_spill]] %s2758_s1  ;;  %30 = vst [vmem:[#allocation2] sm:$0x1] %v29_v0 }
   0x3   :  { %2786 = sst [smem:[#allocation8_spill]] %s2759_s2 }
   0x4   :  { %2787 = sst [smem:[#allocation9_spill]] %s2760_s3 }
   0x5   :  { %2788 = sst [smem:[#allocation10_spill]] %s2761_s4 }
   0x6   :  { %2789 = sst [smem:[#allocation11_spill]] %s2762_s5 }
   0x7   :  { %2790 = sst [smem:[#allocation12_spill]] %s2763_s6 }
   0x8   :  { %2791 = sst [smem:[#allocation13_spill]] %s2764_s7 }
   0x9   :  { %s2792_s5 = sld [smem:[#allocation6_spill]]  ;;  %vm81_vm0 = vcmask 130048  }
   0xf   :  { %v77_v1 = vld [vmem:[%s2792_s5] sm:$0xff]  ;;  %v78_v2 = vld [vmem:[%s2792_s5 + $0x8] sm:$0xff] }
  0x10   :  { %31 = vsyncpa [#allocation4], 0  ;;  %v82_v3 = vsel %vm81_vm0, %v77_v1, 0.0  ;;  %v85_v4 = vsel %vm81_vm0, %v78_v2, 0.0  ;;  %s2793_s6 = sld [smem:[#allocation10_spill]]  ;;  %v2150_v16 = vmov 0.0  }
  0x11   :  { %83 = vadd.xlane.f32.xlu0 %v82_v3  ;;  %1834 = vmatprep.subr.bf16.mxu0 %v2150_v16  ;;  %vm2151_vm1 = vmmov 0   ;;  %s2794_s28 = sld [smem:[#allocation8_spill]]  ;;  %s2795_s0 = sld [smem:[#allocation9_spill]]  ;;  %v2354_v45 = vld [vmem:[%s2765_s8] sm:$0xf] }
  0x12   :  { %1836 = vmatprep.mubr.msk.bf16.mxu0 %vm2151_vm1, %v2150_v16  ;;  %s2796_s24 = sld [smem:[#allocation7_spill]]  ;;  %s2797_s21 = sld [smem:[#allocation12_spill]]  ;;  %v2359_v46 = vld [vmem:[%s2765_s8 + $0x4] sm:$0xf]  ;;  %v2364_v47 = vld [vmem:[%s2765_s8 + $0x8] sm:$0xf] }
  0x13   :  { %s2798_s4 = sld [smem:[#allocation13_spill]]  ;;  %v2369_v48 = vld [vmem:[%s2765_s8 + $0xc] sm:$0xf]  ;;  %v2374_v49 = vld [vmem:[%s2766_s9] ss:$0 sm:$0xff] }
  0x14   :  { %v2379_v50 = vld [vmem:[%s2767_s10] ss:$0 sm:$0xff]  ;;  %v2394_v53 = vld [vmem:[%s2769_s12 + $0x4] sm:$0xf]  ;;  %v2399_v54 = vld [vmem:[%s2769_s12 + $0x8] sm:$0xf] }
  0x15   :  { %86 = vadd.xlane.f32.xlu0 %v85_v4  ;;  %v2384_v51 = vld [vmem:[%s2768_s11] ss:$0 sm:$0xff]  ;;  %v2404_v55 = vld [vmem:[%s2769_s12 + $0xc] sm:$0xf]  ;;  %v2419_v58 = vld [vmem:[%s2771_s14 + $0x4] sm:$0xf] }
  0x16   :  { %v2034_v15 = vld [vmem:[%s2793_s6] sm:$0xff]   ;;  %v2424_v59 = vld [vmem:[%s2771_s14 + $0x8] sm:$0xf]  ;;  %v2429_v60 = vld [vmem:[%s2771_s14 + $0xc] sm:$0xf] }
  0x17   :  { %1835 = vmatpush3.bf16.msra.mxu0 %v2034_v15  ;;  %v1731_v25 = vld [vmem:[%s2794_s28] ss:$0 sm:$0xff]  ;;  %v2434_v61 = vld [vmem:[%s2771_s14 + $0x10] sm:$0xf]  ;;  %v2439_v62 = vld [vmem:[%s2771_s14 + $0x14] sm:$0xf] }
  0x18   :  { %v1732_v29 = vld [vmem:[%s2795_s0] ss:$0 sm:$0xff]  ;;  %v186_v35 = vld [vmem:[%s2796_s24 + $0x1] sm:$0x1]  ;;  %v2334_v41 = vld [vmem:[%s2797_s21 + $0x4] sm:$0xf] }
  0x19   :  { %v185_v34 = vld [vmem:[%s2796_s24] sm:$0x1]  ;;  %v188_v37 = vsub.f32 1.0, %v186_v35  ;;  %v2339_v42 = vld [vmem:[%s2797_s21 + $0x8] sm:$0xf] }
  0x1a   :  { %v187_v36 = vsub.f32 1.0, %v185_v34  ;;  %v2329_v40 = vld [vmem:[%s2797_s21] sm:$0xf]  ;;  %v2344_v43 = vld [vmem:[%s2797_s21 + $0xc] sm:$0xf]  ;;  %s2799_s21 = sld [smem:[#allocation11_spill]] }
  0x1b   :  { %v2324_v39 = vmul.f32 -1e+09, %v188_v37  ;;  %v2349_v44 = vld [vmem:[%s2798_s4] ss:$0 sm:$0xff]  ;;  %v2444_v63 = vld [vmem:[%s2771_s14 + $0x18] sm:$0xf] }
  0x1c   :  { %v2322_v38 = vmul.f32 -1e+09, %v187_v36  ;;  %v2389_v52 = vld [vmem:[%s2769_s12] sm:$0xf]  ;;  %v2449_v0 = vld [vmem:[%s2771_s14 + $0x1c] sm:$0xf] }
  0x1d   :  { %v2409_v56 = vld [vmem:[%s2770_s13] ss:$0 sm:$0xff] }
  0x1e   :  { %v2414_v57 = vld [vmem:[%s2771_s14] sm:$0xf]  ;;  %s2473_s14 = smov 0  }
  0x1f   :  { %v2464_v3 = vld [vmem:[%s2774_s17] ss:$0 sm:$0xff] }
  0x20   :  { %v1733_v4 = vld [vmem:[%s2799_s21] ss:$0 sm:$0xff] }
  0x9e   :  { %v84_v5 = vpop.xlane.xlu0 %83 }
  0x9f   :  { %v89_v6 = vmul.f32 0.0625, %v84_v5 }
  0xa1   :  { %v91_v7 = vsub.f32 %v77_v1, %v89_v6  ;;  %v2454_v1 = vld [vmem:[%s2772_s15] ss:$0 sm:$0xff] }
  0xa2   :  { %v87_v8 = vpop.xlane.xlu0 %86 }
  0xa3   :  { %v90_v9 = vmul.f32 0.0625, %v87_v8  ;;  %v93_v10 = vmul.f32 %v91_v7, %v91_v7 }
  0xa5   :  { %v92_v11 = vsub.f32 %v78_v2, %v90_v9  ;;  %v95_v12 = vsel %vm81_vm0, %v93_v10, 0.0  ;;  %v2459_v2 = vld [vmem:[%s2773_s16] ss:$0 sm:$0xff] }
  0xa6   :  { %96 = vadd.xlane.f32.xlu1 %v95_v12 }
  0xa7   :  { %v94_v13 = vmul.f32 %v92_v11, %v92_v11 }
  0xa9   :  { %v98_v14 = vsel %vm81_vm0, %v94_v13, 0.0 }
  0xaa   :  { %99 = vadd.xlane.f32.xlu1 %v98_v14 }
 0x133   :  { %v97_v17 = vpop.xlane.xlu1 %96 }
 0x134   :  { %v101_v18 = vmul.f32 0.0625, %v97_v17 }
 0x136   :  { %v103_v19 = vadd.f32 1e-12, %v101_v18 }
 0x137   :  { %v100_v20 = vpop.xlane.xlu1 %99 }
 0x138   :  { %2035 = vrsqrt.f32 %v103_v19  ;;  %v102_v21 = vmul.f32 0.0625, %v100_v20 }
 0x13a   :  { %v104_v22 = vadd.f32 1e-12, %v102_v21 }
 0x13c   :  { %2037 = vrsqrt.f32 %v104_v22 }
 0x142   :  { %v2036_v23 = vpop.eup %2035 }
 0x143   :  { %v107_v24 = vmul.f32 %v2036_v23, %v91_v7 }
 0x145   :  { %v115_v28 = vmul.f32 %v1731_v25, %v107_v24 }
 0x146   :  { %v2038_v26 = vpop.eup %2037 }
 0x147   :  { %v108_v27 = vmul.f32 %v2038_v26, %v92_v11  ;;  %v123_v31 = vadd.f32 %v1732_v29, %v115_v28 }
 0x149   :  { %v116_v30 = vmul.f32 %v1731_v25, %v108_v27 }
 0x14b   :  { %v124_v32 = vadd.f32 %v1732_v29, %v116_v30 }
 0x14d   :  { %v127_v33 = vpack.c.bf16 %v124_v32, %v123_v31 }
 0x14f   :  { %1837 = vmatmul.mubr.msk.bf16.vlgmr.msra.gmra.mrb[0].mxu0 %vm81_vm0, %v127_v33 }
 0x222   :  { %v178_v5 = vpop.f32.mrb[0].mxu0 }
 0x223   :  { %v179_v6 = vadd.f32 %v1733_v4, %v178_v5   ;;  %v1838_v7 = vpop.f32.mrb[1].mxu0 }
 0x224   :  { %v181_v8 = vpop.f32.mrb[2].mxu0 }
 0x225   :  { %v182_v9 = vadd.f32 %v1733_v4, %v181_v8   ;;  %v1839_v10 = vpop.f32.mrb[3].mxu0 }
 0x226 LB: > { %v1737_v11 = vcombine.low %v2329_v40, %v2334_v41  ;;  %v2152_v12 = vmov 0.0   ;;  %vm2153_vm2 = vmmov 0   ;;  %v1738_v13 = vcombine.low %v2339_v42, %v2344_v43  ;;  %s2154_s15 = smov 96   ;;  %s2155_s16 = smov 64   ;;  %s2148_s14 = sphi %s2473_s14, %s224_s14   ;;  %v2144_v6 = vphi %v179_v6, %v2801_v6   ;;  %v2140_v9 = vphi %v182_v9, %v2800_v9  }
 0x227   : > { %1840 = vmatprep.subr.bf16.mxu0 %v2152_v12  ;;  %1844 = vmatprep.mubr.msk.bf16.mxu0 %vm2153_vm2, %v2152_v12  ;;  %v227_v14 = vpack.c.bf16 %v2140_v9, %v2144_v6  ;;  %vm246_vm3 = vcmask 261120   ;;  %vm308_vm4 = vcmask 64512   ;;  %v295_v28 = vlaneseq  ;;  %s2156_s17 = smov 88   ;;  %s2157_s2 = smov 120  }
 0x228   : > { %1841 = vmatpush3.bf16.msra.mxu0 %v1737_v11  ;;  %1848 = vmatprep.subr.bf16.mxu1 %v2152_v12  ;;  %vm433_vm5 = vcmask 1043456   ;;  %s2158_s6 = smov 56   ;;  %s2159_s27 = smov 80   ;;  %vm1213_vm6 = vcmask 195584   ;;  %vm1436_vm7 = vcmask 523264  }
 0x229   : > { %1842 = vmatprep.subr.bf16.mxu0 %v2152_v12  ;;  %1850 = vmatprep.mubr.msk.bf16.mxu1 %vm2153_vm2, %v2152_v12  ;;  %v296_v29 = vshrl.u32 %v295_v28, 7  ;;  %s2160_s12 = smov 112   ;;  %s2161_s7 = smov 48  }
 0x22a   : > { %s2162_s13 = smov 72   ;;  %s2163_s28 = smov 104  }
 0x22b   : > { %v297_v30 = vsub.s32 0, %v296_v29  ;;  %s2164_s29 = smov 40   ;;  %s2165_s3 = smov 8  }
 0x22c   : > { %1843 = vmatpush3.bf16.msra.mxu0 %v1738_v13  ;;  %s2166_s0 = smov 16   ;;  %s2167_s4 = smov 24  }
 0x22d   : > { %1854 = vmatprep.subr.bf16.mxu0 %v2152_v12  ;;  %v2522_v31 = vrot.slane %v2322_v38, %v297_v30  ;;  %v2526_v35 = vrot.slane %v2324_v39, %v297_v30  ;;  %s224_s14 = sadd.s32 1, %s2148_s14  }
 0x22e   : > { %p221_p0 = scmp.ge.s32.totalorder %s224_s14, 2  }
 0x22f   : > { %1845 = vmatmul.mubr.msk.bf16.vlgmr.msra.gmra.mrb[0].mxu0 %vm246_vm3, %v227_v14  ;;  %vm1528_vm8 = vcmask (%p221_p0), 1041409   ;;  %v1618_v42 = vld [vmem:[%s2777_s20] sm:$0xff] (%p221_p0)  ;;  %v1619_v43 = vld [vmem:[%s2777_s20 + $0x8] sm:$0xff] (%p221_p0)  ;;  %vm1531_vm9 = vcmask (%p221_p0), 254976  }
 0x230   : > { %1856 = vmatprep.mubr.msk.bf16.mxu0 %vm2153_vm2, %v2152_v12 }
 0x302   : > { %v284_v15 = vpop.f32.mrb[0].mxu0 }
 0x303   : > { %v285_v17 = vadd.f32 %v2349_v44, %v284_v15  ;;  %v1846_v18 = vpop.f32.mrb[1].mxu0 }
 0x304   : > { %v287_v19 = vpop.f32.mrb[2].mxu0 }
 0x305   : > { %v2502_v20 = vpack.c.bf16 %v285_v17, %v285_v17  ;;  %v288_v21 = vadd.f32 %v2349_v44, %v287_v19  ;;  %v1847_v22 = vpop.f32.mrb[3].mxu0  ;;  %v2168_v44 = vmov (%p221_p0), 0.0|0.0  }
 0x307   : > { %306 = vrot.lane.b32.xlu0 %v2502_v20, %s2154_s15  ;;  %v2506_v23 = vpack.c.bf16 %v288_v21, %v288_v21 }
 0x30b   : > { %356 = vrot.lane.b32.xlu0 %v2506_v23, %s2154_s15 }
 0x379   : > { %v307_v24 = vpop.permute.xlu0 %306 }
 0x37a   : > { %v313_v25 = vsel %vm308_vm4, %v307_v24, 0 }
 0x37b   : > { %1849 = vmatpush3.bf16.xpose.msra.mxu1 %v313_v25 }
 0x37c   : > { %1860 = vmatprep.subr.bf16.mxu1 %v2152_v12 }
 0x37d   : > { %v357_v26 = vpop.permute.xlu0 %356 }
 0x37e   : > { %v362_v27 = vsel %vm308_vm4, %v357_v26, 0 }
 0x37f   : > { %1855 = vmatpush3.bf16.xpose.msra.mxu0 %v362_v27 }
 0x380   : > { %1866 = vmatprep.subr.bf16.mxu0 %v2152_v12 }
 0x382   : > { %1851 = vmatmul.mubr.msk.bf16.vlgmr.msra.gmra.mrb[0].mxu1 %vm308_vm4, %v2502_v20 }
 0x383   : > { %1862 = vmatprep.mubr.msk.bf16.mxu1 %vm2153_vm2, %v2152_v12 }
 0x386   : > { %1857 = vmatmul.mubr.msk.bf16.vlgmr.msra.gmra.mrb[4].mxu0 %vm308_vm4, %v2506_v23 }
 0x387   : > { %1868 = vmatprep.mubr.msk.bf16.mxu0 %vm2153_vm2, %v2152_v12 }
 0x455   : > { %v349_v32 = vpop.f32.mrb[0].mxu1 }
 0x456   : > { %v350_v33 = vadd.f32 %v349_v32, %v2522_v31  ;;  %v1852_v34 = vpop.f32.mrb[1].mxu1 }
 0x457   : > { %v352_v36 = vpop.f32.mrb[2].mxu1 }
 0x458   : > { %v1853_v37 = vpop.f32.mrb[3].mxu1  ;;  %v404_v4 = vsel %vm308_vm4, %v350_v33, -inf }
 0x459   : > { %405 = vmax.xlane.f32.xlu1 %v404_v4  ;;  %v398_v5 = vpop.f32.mrb[4].mxu0 }
 0x45a   : > { %v399_v7 = vadd.f32 %v398_v5, %v2526_v35  ;;  %v1858_v8 = vpop.f32.mrb[5].mxu0 }
 0x45b   : > { %v401_v10 = vpop.f32.mrb[6].mxu0 }
 0x45c   : > { %v1859_v11 = vpop.f32.mrb[7].mxu0  ;;  %v407_v13 = vsel %vm308_vm4, %v399_v7, -inf }
 0x45d   : > { %408 = vmax.xlane.f32.xlu1 %v407_v13 }
 0x46e   : > { %428 = vrot.lane.b32.xlu1 %v2502_v20, %s2155_s16 }
 0x472   : > { %477 = vrot.lane.b32.xlu1 %v2506_v23, %s2155_s16 }
 0x476   : > { %527 = vrot.lane.b32.xlu1 %v2502_v20, %s2156_s17 }
 0x4e6   : > { %v406_v14 = vpop.xlane.xlu1 %405 }
 0x4e7   : > { %v410_v15 = vsub.f32 %v350_v33, %v406_v14 }
 0x4e9   : > { %v412_v17 = vmul.f32 1.442695, %v410_v15 }
 0x4ea   : > { %v409_v18 = vpop.xlane.xlu1 %408 }
 0x4eb   : > { %2054 = vpow2.f32 %v412_v17  ;;  %v411_v19 = vsub.f32 %v399_v7, %v409_v18 }
 0x4ed   : > { %v414_v21 = vmul.f32 1.442695, %v411_v19 }
 0x4ee   : > { %v429_v22 = vpop.permute.xlu1 %428 }
 0x4ef   : > { %2056 = vpow2.f32 %v414_v21  ;;  %v435_v24 = vsel %vm433_vm5, %v429_v22, 0 }
 0x4f0   : > { %1861 = vmatpush3.bf16.msra.mxu1 %v435_v24 }
 0x4f1   : > { %1872 = vmatprep.subr.bf16.mxu1 %v2152_v12 }
 0x4f2   : > { %v478_v25 = vpop.permute.xlu1 %477 }
 0x4f3   : > { %v483_v26 = vsel %vm433_vm5, %v478_v25, 0 }
 0x4f4   : > { %1867 = vmatpush3.bf16.msra.mxu0 %v483_v26 }
 0x4f5   : > { %v2055_v27 = vpop.eup %2054  ;;  %1878 = vmatprep.subr.bf16.mxu0 %v2152_v12 }
 0x4f6   : > { %v416_v28 = vsel %vm308_vm4, %v2055_v27, 0.0  ;;  %v528_v32 = vpop.permute.xlu1 %527 }
 0x4f7   : > { %417 = vadd.xlane.f32.xlu0 %v416_v28  ;;  %v533_v7 = vsel %vm308_vm4, %v528_v32, 0 }
 0x4f9   : > { %v2057_v29 = vpop.eup %2056 }
 0x4fa   : > { %v419_v30 = vsel %vm308_vm4, %v2057_v29, 0.0 }
 0x4fb   : > { %420 = vadd.xlane.f32.xlu1 %v419_v30 }
 0x50c   : > { %577 = vrot.lane.b32.xlu1 %v2506_v23, %s2156_s17 }
 0x50d   : > { %525 = vrot.lane.b32.xlu0 %v2502_v20, %s2157_s2 }
 0x510   : > { %575 = vrot.lane.b32.xlu1 %v2506_v23, %s2157_s2 }
 0x584   : > { %v418_v33 = vpop.xlane.xlu0 %417 }
 0x585   : > { %2058 = vrcp.f32 %v418_v33 }
 0x588   : > { %v421_v34 = vpop.xlane.xlu1 %420  ;;  %v526_v14 = vpop.permute.xlu0 %525 }
 0x589   : > { %2060 = vrcp.f32 %v421_v34 }
 0x58c   : > { %v578_v10 = vpop.permute.xlu1 %577 }
 0x58d   : > { %v583_v13 = vsel %vm308_vm4, %v578_v10, 0 }
 0x58f   : > { %v2059_v36 = vpop.eup %2058 }
 0x590   : > { %v424_v37 = vmul.f32 %v2059_v36, %v2055_v27  ;;  %v576_v15 = vpop.permute.xlu1 %575 }
 0x592   : > { %v426_v4 = vpack.c.bf16 %v424_v37, %v424_v37 }
 0x593   : > { %v2061_v5 = vpop.eup %2060 }
 0x594   : > { %v425_v8 = vmul.f32 %v2061_v5, %v2057_v29  ;;  %1863 = vmatmul.mubr.msk.bf16.vlgmr.msra.gmra.mrb[4].mxu1 %vm308_vm4, %v426_v4 }
 0x595   : > { %1873 = vmatpush3.bf16.xpose.msra.mxu1 %v533_v7  ;;  %1874 = vmatprep.mubr.msk.bf16.mxu1 %vm2153_vm2, %v2152_v12 }
 0x596   : > { %v427_v11 = vpack.c.bf16 %v425_v8, %v425_v8  ;;  %1884 = vmatprep.subr.bf16.mxu1 %v2152_v12 }
 0x598   : > { %1869 = vmatmul.mubr.msk.bf16.vlgmr.msra.gmra.mrb[8].mxu0 %vm308_vm4, %v427_v11 }
 0x599   : > { %1879 = vmatpush3.bf16.xpose.msra.mxu0 %v583_v13  ;;  %1880 = vmatprep.mubr.msk.bf16.mxu0 %vm2153_vm2, %v2152_v12 }
 0x59a   : > { %1890 = vmatprep.subr.bf16.mxu0 %v2152_v12 }
 0x59c   : > { %1875 = vmatmul.mubr.msk.bf16.vlgmr.msra.gmra.mrb[8].mxu1 %vm308_vm4, %v526_v14 }
 0x59d   : > { %1886 = vmatprep.mubr.msk.bf16.mxu1 %vm2153_vm2, %v2152_v12 }
 0x5a0   : > { %1881 = vmatmul.mubr.msk.bf16.vlgmr.msra.gmra.mrb[12].mxu0 %vm308_vm4, %v576_v15 }
 0x5a1   : > { %1892 = vmatprep.mubr.msk.bf16.mxu0 %vm2153_vm2, %v2152_v12 }
 0x667   : > { %v2559_v17 = vpop.f32.mrb[4].mxu1 }
 0x668   : > { %v1864_v18 = vpop.f32.mrb[5].mxu1 }
 0x669   : > { %v474_v19 = vpop.f32.mrb[6].mxu1 }
 0x66a   : > { %v1865_v21 = vpop.f32.mrb[7].mxu1 }
 0x66b   : > { %v2561_v22 = vpop.f32.mrb[8].mxu0 }
 0x66c   : > { %v1870_v24 = vpop.f32.mrb[9].mxu0 }
 0x66d   : > { %v522_v25 = vpop.f32.mrb[10].mxu0 }
 0x66e   : > { %v1871_v26 = vpop.f32.mrb[11].mxu0 }
 0x66f   : > { %v569_v27 = vpop.f32.mrb[8].mxu1 }
 0x670   : > { %v570_v28 = vadd.f32 %v569_v27, %v2522_v31  ;;  %v1876_v29 = vpop.f32.mrb[9].mxu1 }
 0x671   : > { %v572_v30 = vpop.f32.mrb[10].mxu1 }
 0x672   : > { %v1877_v32 = vpop.f32.mrb[11].mxu1  ;;  %v625_v33 = vsel %vm308_vm4, %v570_v28, -inf }
 0x673   : > { %626 = vmax.xlane.f32.xlu1 %v625_v33  ;;  %v619_v34 = vpop.f32.mrb[12].mxu0 }
 0x674   : > { %v620_v36 = vadd.f32 %v619_v34, %v2526_v35  ;;  %v1882_v37 = vpop.f32.mrb[13].mxu0 }
 0x675   : > { %v622_v4 = vpop.f32.mrb[14].mxu0 }
 0x676   : > { %v1883_v5 = vpop.f32.mrb[15].mxu0  ;;  %v628_v7 = vsel %vm308_vm4, %v620_v36, -inf }
 0x677   : > { %629 = vmax.xlane.f32.xlu0 %v628_v7 }
 0x684   : > { %649 = vrot.lane.b32.xlu1 %v2502_v20, %s2158_s6 }
 0x688   : > { %747 = vrot.lane.b32.xlu1 %v2502_v20, %s2159_s27 }
 0x68d   : > { %697 = vrot.lane.b32.xlu0 %v2506_v23, %s2158_s6 }
 0x691   : > { %745 = vrot.lane.b32.xlu0 %v2502_v20, %s2160_s12 }
 0x700   : > { %v627_v8 = vpop.xlane.xlu1 %626 }
 0x701   : > { %v631_v10 = vsub.f32 %v570_v28, %v627_v8 }
 0x703   : > { %v633_v11 = vmul.f32 1.442695, %v631_v10 }
 0x704   : > { %v650_v13 = vpop.permute.xlu1 %649  ;;  %v630_v14 = vpop.xlane.xlu0 %629 }
 0x705   : > { %2062 = vpow2.f32 %v633_v11  ;;  %v655_v15 = vsel %vm433_vm5, %v650_v13, 0  ;;  %v632_v18 = vsub.f32 %v620_v36, %v630_v14 }
 0x706   : > { %1885 = vmatpush3.bf16.msra.mxu1 %v655_v15 }
 0x707   : > { %v635_v19 = vmul.f32 1.442695, %v632_v18  ;;  %1896 = vmatprep.subr.bf16.mxu1 %v2152_v12 }
 0x708   : > { %v698_v21 = vpop.permute.xlu0 %697  ;;  %v748_v29 = vpop.permute.xlu1 %747 }
 0x709   : > { %2064 = vpow2.f32 %v635_v19  ;;  %v703_v24 = vsel %vm433_vm5, %v698_v21, 0  ;;  %v753_v4 = vsel %vm308_vm4, %v748_v29, 0 }
 0x70a   : > { %1891 = vmatpush3.bf16.msra.mxu0 %v703_v24 }
 0x70b   : > { %1902 = vmatprep.subr.bf16.mxu0 %v2152_v12 }
 0x70c   : > { %v746_v11 = vpop.permute.xlu0 %745 }
 0x70f   : > { %v2063_v25 = vpop.eup %2062 }
 0x710   : > { %v637_v26 = vsel %vm308_vm4, %v2063_v25, 0.0 }
 0x711   : > { %638 = vadd.xlane.f32.xlu1 %v637_v26 }
 0x713   : > { %v2065_v27 = vpop.eup %2064 }
 0x714   : > { %v640_v28 = vsel %vm308_vm4, %v2065_v27, 0.0 }
 0x715   : > { %641 = vadd.xlane.f32.xlu1 %v640_v28 }
 0x726   : > { %797 = vrot.lane.b32.xlu1 %v2506_v23, %s2159_s27 }
 0x72a   : > { %795 = vrot.lane.b32.xlu1 %v2506_v23, %s2160_s12 }
 0x79e   : > { %v639_v30 = vpop.xlane.xlu1 %638 }
 0x79f   : > { %2066 = vrcp.f32 %v639_v30 }
 0x7a2   : > { %v642_v32 = vpop.xlane.xlu1 %641 }
 0x7a3   : > { %2068 = vrcp.f32 %v642_v32 }
 0x7a6   : > { %v798_v7 = vpop.permute.xlu1 %797 }
 0x7a7   : > { %v803_v10 = vsel %vm308_vm4, %v798_v7, 0 }
 0x7a9   : > { %v2067_v33 = vpop.eup %2066 }
 0x7aa   : > { %v645_v34 = vmul.f32 %v2067_v33, %v2063_v25  ;;  %v796_v13 = vpop.permute.xlu1 %795 }
 0x7ac   : > { %v647_v36 = vpack.c.bf16 %v645_v34, %v645_v34 }
 0x7ad   : > { %v2069_v37 = vpop.eup %2068 }
 0x7ae   : > { %v646_v5 = vmul.f32 %v2069_v37, %v2065_v27  ;;  %1887 = vmatmul.mubr.msk.bf16.vlgmr.msra.gmra.mrb[12].mxu1 %vm308_vm4, %v647_v36 }
 0x7af   : > { %1897 = vmatpush3.bf16.xpose.msra.mxu1 %v753_v4  ;;  %1898 = vmatprep.mubr.msk.bf16.mxu1 %vm2153_vm2, %v2152_v12 }
 0x7b0   : > { %v648_v8 = vpack.c.bf16 %v646_v5, %v646_v5  ;;  %1908 = vmatprep.subr.bf16.mxu1 %v2152_v12 }
 0x7b2   : > { %1893 = vmatmul.mubr.msk.bf16.vlgmr.msra.gmra.mrb[16].mxu0 %vm308_vm4, %v648_v8 }
 0x7b3   : > { %1903 = vmatpush3.bf16.xpose.msra.mxu0 %v803_v10  ;;  %1904 = vmatprep.mubr.msk.bf16.mxu0 %vm2153_vm2, %v2152_v12 }
 0x7b4   : > { %1914 = vmatprep.subr.bf16.mxu0 %v2152_v12 }
 0x7b6   : > { %1899 = vmatmul.mubr.msk.bf16.vlgmr.msra.gmra.mrb[16].mxu1 %vm308_vm4, %v746_v11 }
 0x7b7   : > { %1910 = vmatprep.mubr.msk.bf16.mxu1 %vm2153_vm2, %v2152_v12 }
 0x7ba   : > { %1905 = vmatmul.mubr.msk.bf16.vlgmr.msra.gmra.mrb[20].mxu0 %vm308_vm4, %v796_v13 }
 0x7bb   : > { %1916 = vmatprep.mubr.msk.bf16.mxu0 %vm2153_vm2, %v2152_v12 }
 0x881   : > { %v2595_v14 = vpop.f32.mrb[12].mxu1 }
 0x882   : > { %v1888_v15 = vpop.f32.mrb[13].mxu1 }
 0x883   : > { %v694_v18 = vpop.f32.mrb[14].mxu1 }
 0x884   : > { %v1889_v19 = vpop.f32.mrb[15].mxu1 }
 0x885   : > { %v2597_v21 = vpop.f32.mrb[16].mxu0 }
 0x886   : > { %v2039_v24 = vpack.i.bf16 %v2597_v21, %v2595_v14  ;;  %v1894_v25 = vpop.f32.mrb[17].mxu0 }
 0x887   : > { %v742_v26 = vpop.f32.mrb[18].mxu0 }
 0x888   : > { %v1895_v27 = vpop.f32.mrb[19].mxu0 }
 0x889   : > { %v789_v28 = vpop.f32.mrb[16].mxu1 }
 0x88a   : > { %v790_v29 = vadd.f32 %v789_v28, %v2522_v31  ;;  %v1900_v30 = vpop.f32.mrb[17].mxu1 }
 0x88b   : > { %v792_v32 = vpop.f32.mrb[18].mxu1 }
 0x88c   : > { %v1901_v33 = vpop.f32.mrb[19].mxu1  ;;  %v845_v34 = vsel %vm308_vm4, %v790_v29, -inf }
 0x88d   : > { %846 = vmax.xlane.f32.xlu0 %v845_v34  ;;  %v839_v36 = vpop.f32.mrb[20].mxu0 }
 0x88e   : > { %v840_v37 = vadd.f32 %v839_v36, %v2526_v35  ;;  %v1906_v4 = vpop.f32.mrb[21].mxu0 }
 0x88f   : > { %v842_v5 = vpop.f32.mrb[22].mxu0 }
 0x890   : > { %v1907_v7 = vpop.f32.mrb[23].mxu0  ;;  %v848_v8 = vsel %vm308_vm4, %v840_v37, -inf }
 0x891   : > { %849 = vmax.xlane.f32.xlu1 %v848_v8 }
 0x8a2   : > { %869 = vrot.lane.b32.xlu1 %v2502_v20, %s2161_s7 }
 0x8a6   : > { %967 = vrot.lane.b32.xlu1 %v2502_v20, %s2162_s13 }
 0x8aa   : > { %1017 = vrot.lane.b32.xlu1 %v2506_v23, %s2162_s13 }
 0x8ae   : > { %1015 = vrot.lane.b32.xlu1 %v2506_v23, %s2163_s28 }
 0x91a   : > { %v847_v10 = vpop.xlane.xlu0 %846 }
 0x91b   : > { %v851_v11 = vsub.f32 %v790_v29, %v847_v10 }
 0x91d   : > { %v853_v13 = vmul.f32 1.442695, %v851_v11 }
 0x91e   : > { %v850_v15 = vpop.xlane.xlu1 %849 }
 0x91f   : > { %2070 = vpow2.f32 %v853_v13  ;;  %v852_v18 = vsub.f32 %v840_v37, %v850_v15 }
 0x921   : > { %v855_v19 = vmul.f32 1.442695, %v852_v18 }
 0x922   : > { %v870_v25 = vpop.permute.xlu1 %869 }
 0x923   : > { %2072 = vpow2.f32 %v855_v19  ;;  %v875_v26 = vsel %vm433_vm5, %v870_v25, 0 }
 0x924   : > { %1909 = vmatpush3.bf16.msra.mxu1 %v875_v26 }
 0x925   : > { %1920 = vmatprep.subr.bf16.mxu1 %v2152_v12 }
 0x926   : > { %v968_v4 = vpop.permute.xlu1 %967 }
 0x927   : > { %v973_v10 = vsel %vm308_vm4, %v968_v4, 0 }
 0x929   : > { %v2071_v27 = vpop.eup %2070 }
 0x92a   : > { %v857_v28 = vsel %vm308_vm4, %v2071_v27, 0.0  ;;  %v1018_v13 = vpop.permute.xlu1 %1017 }
 0x92b   : > { %858 = vadd.xlane.f32.xlu0 %v857_v28  ;;  %v1023_v18 = vsel %vm308_vm4, %v1018_v13, 0 }
 0x92d   : > { %v2073_v30 = vpop.eup %2072 }
 0x92e   : > { %v860_v32 = vsel %vm308_vm4, %v2073_v30, 0.0  ;;  %v1016_v25 = vpop.permute.xlu1 %1015 }
 0x92f   : > { %861 = vadd.xlane.f32.xlu0 %v860_v32 }
 0x945   : > { %917 = vrot.lane.b32.xlu0 %v2506_v23, %s2161_s7 }
 0x949   : > { %965 = vrot.lane.b32.xlu0 %v2502_v20, %s2163_s28 }
 0x9b8   : > { %v859_v29 = vpop.xlane.xlu0 %858 }
 0x9b9   : > { %2074 = vrcp.f32 %v859_v29 }
 0x9bc   : > { %v862_v33 = vpop.xlane.xlu0 %861 }
 0x9bd   : > { %2076 = vrcp.f32 %v862_v33 }
 0x9c0   : > { %v918_v34 = vpop.permute.xlu0 %917 }
 0x9c1   : > { %v923_v36 = vsel %vm433_vm5, %v918_v34, 0 }
 0x9c2   : > { %1915 = vmatpush3.bf16.msra.mxu0 %v923_v36 }
 0x9c3   : > { %v2075_v37 = vpop.eup %2074  ;;  %1926 = vmatprep.subr.bf16.mxu0 %v2152_v12 }
 0x9c4   : > { %v865_v5 = vmul.f32 %v2075_v37, %v2071_v27  ;;  %v966_v19 = vpop.permute.xlu0 %965 }
 0x9c6   : > { %v867_v7 = vpack.c.bf16 %v865_v5, %v865_v5 }
 0x9c7   : > { %v2077_v8 = vpop.eup %2076 }
 0x9c8   : > { %v866_v11 = vmul.f32 %v2077_v8, %v2073_v30  ;;  %1911 = vmatmul.mubr.msk.bf16.vlgmr.msra.gmra.mrb[20].mxu1 %vm308_vm4, %v867_v7 }
 0x9c9   : > { %1921 = vmatpush3.bf16.xpose.msra.mxu1 %v973_v10  ;;  %1922 = vmatprep.mubr.msk.bf16.mxu1 %vm2153_vm2, %v2152_v12 }
 0x9ca   : > { %v868_v15 = vpack.c.bf16 %v866_v11, %v866_v11  ;;  %1932 = vmatprep.subr.bf16.mxu1 %v2152_v12 }
 0x9cc   : > { %1917 = vmatmul.mubr.msk.bf16.vlgmr.msra.gmra.mrb[24].mxu0 %vm308_vm4, %v868_v15 }
 0x9cd   : > { %1927 = vmatpush3.bf16.xpose.msra.mxu0 %v1023_v18  ;;  %1928 = vmatprep.mubr.msk.bf16.mxu0 %vm2153_vm2, %v2152_v12 }
 0x9ce   : > { %1938 = vmatprep.subr.bf16.mxu0 %v2152_v12 }
 0x9d0   : > { %1923 = vmatmul.mubr.msk.bf16.vlgmr.msra.gmra.mrb[24].mxu1 %vm308_vm4, %v966_v19 }
 0x9d1   : > { %1934 = vmatprep.mubr.msk.bf16.mxu1 %vm2153_vm2, %v2152_v12 }
 0x9d4   : > { %1929 = vmatmul.mubr.msk.bf16.vlgmr.msra.gmra.mrb[28].mxu0 %vm308_vm4, %v1016_v25 }
 0x9d5   : > { %1940 = vmatprep.mubr.msk.bf16.mxu0 %vm2153_vm2, %v2152_v12 }
 0xa9b   : > { %v911_v26 = vpop.f32.mrb[20].mxu1 }
 0xa9c   : > { %v1912_v27 = vpop.f32.mrb[21].mxu1 }
 0xa9d   : > { %v914_v28 = vpop.f32.mrb[22].mxu1 }
 0xa9e   : > { %v1913_v30 = vpop.f32.mrb[23].mxu1 }
 0xa9f   : > { %v959_v32 = vpop.f32.mrb[24].mxu0 }
 0xaa0   : > { %v2044_v29 = vpack.i.bf16 %v959_v32, %v911_v26  ;;  %v1918_v33 = vpop.f32.mrb[25].mxu0 }
 0xaa1   : > { %v962_v34 = vpop.f32.mrb[26].mxu0 }
 0xaa2   : > { %v1919_v36 = vpop.f32.mrb[27].mxu0 }
 0xaa3   : > { %v1009_v37 = vpop.f32.mrb[24].mxu1 }
 0xaa4   : > { %v1010_v4 = vadd.f32 %v1009_v37, %v2522_v31  ;;  %v1924_v5 = vpop.f32.mrb[25].mxu1 }
 0xaa5   : > { %v1012_v7 = vpop.f32.mrb[26].mxu1 }
 0xaa6   : > { %v1925_v8 = vpop.f32.mrb[27].mxu1  ;;  %v1065_v10 = vsel %vm308_vm4, %v1010_v4, -inf }
 0xaa7   : > { %1066 = vmax.xlane.f32.xlu0 %v1065_v10  ;;  %v1059_v11 = vpop.f32.mrb[28].mxu0 }
 0xaa8   : > { %v1060_v13 = vadd.f32 %v1059_v11, %v2526_v35  ;;  %v1930_v15 = vpop.f32.mrb[29].mxu0  ;;  %v1757_v11 = vcombine.low %v2354_v45, %v2359_v46  ;;  %v1988_v45 = vpack.c.bf16 (%p221_p0), %v1619_v43, %v1618_v42 }
 0xaa9   : > { %v1062_v18 = vpop.f32.mrb[30].mxu0 }
 0xaaa   : > { %v1931_v19 = vpop.f32.mrb[31].mxu0  ;;  %v1068_v25 = vsel %vm308_vm4, %v1060_v13, -inf }
 0xaab   : > { %1069 = vmax.xlane.f32.xlu1 %v1068_v25 }
 0xabc   : > { %1089 = vrot.lane.b32.xlu1 %v2502_v20, %s2164_s29 }
 0xac0   : > { %2040 = vrot.lane.b32.xlu1 %v2039_v24, %s2165_s3 }
 0xac4   : > { %2045 = vrot.lane.b32.xlu1 %v2044_v29, %s2166_s0 }
 0xb34   : > { %v1067_v31 = vpop.xlane.xlu0 %1066 }
 0xb35   : > { %v1071_v26 = vsub.f32 %v1010_v4, %v1067_v31 }
 0xb37   : > { %v1073_v27 = vmul.f32 1.442695, %v1071_v26 }
 0xb38   : > { %v1070_v35 = vpop.xlane.xlu1 %1069 }
 0xb39   : > { %2078 = vpow2.f32 %v1073_v27  ;;  %v1072_v28 = vsub.f32 %v1060_v13, %v1070_v35  ;;  %v1758_v13 = vcombine.low %v2364_v47, %v2369_v48 }
 0xb3b   : > { %v1075_v30 = vmul.f32 1.442695, %v1072_v28 }
 0xb3c   : > { %v1090_v32 = vpop.permute.xlu1 %1089 }
 0xb3d   : > { %2080 = vpow2.f32 %v1075_v30  ;;  %v1095_v33 = vsel %vm433_vm5, %v1090_v32, 0 }
 0xb3e   : > { %1933 = vmatpush3.bf16.msra.mxu1 %v1095_v33 }
 0xb3f   : > { %1944 = vmatprep.subr.bf16.mxu1 %v2152_v12 }
 0xb40   : > { %v2041_v30 = vpop.permute.xlu1 %2040 }
 0xb41   : > { %v2043_v33 = vunpack.i.h.bf16 %v2041_v30 }
 0xb43   : > { %v2079_v20 = vpop.eup %2078 }
 0xb44   : > { %v1077_v14 = vsel %vm308_vm4, %v2079_v20, 0.0  ;;  %v2046_v32 = vpop.permute.xlu1 %2045 }
 0xb45   : > { %1078 = vadd.xlane.f32.xlu0 %v1077_v14  ;;  %v2048_v14 = vunpack.i.h.bf16 %v2046_v32 }
 0xb47   : > { %v2081_v21 = vpop.eup %2080 }
 0xb48   : > { %v1080_v24 = vsel %vm308_vm4, %v2081_v21, 0.0 }
 0xb49   : > { %1081 = vadd.xlane.f32.xlu0 %v1080_v24 }
 0xb5f   : > { %1137 = vrot.lane.b32.xlu0 %v2506_v23, %s2164_s29 }
 0xbd2   : > { %v1079_v29 = vpop.xlane.xlu0 %1078 }
 0xbd3   : > { %2082 = vrcp.f32 %v1079_v29 }
 0xbd6   : > { %v1082_v34 = vpop.xlane.xlu0 %1081 }
 0xbd7   : > { %2084 = vrcp.f32 %v1082_v34  ;;  %v1210_v34 = vsel %vm308_vm4, %v2561_v22, %v2043_v33 }
 0xbda   : > { %v1138_v36 = vpop.permute.xlu0 %1137 }
 0xbdb   : > { %v1143_v37 = vsel %vm433_vm5, %v1138_v36, 0 }
 0xbdc   : > { %1939 = vmatpush3.bf16.msra.mxu0 %v1143_v37 }
 0xbdd   : > { %v2083_v4 = vpop.eup %2082  ;;  %1952 = vmatprep.subr.bf16.mxu0 %v2152_v12 }
 0xbde   : > { %v1085_v5 = vmul.f32 %v2083_v4, %v2079_v20  ;;  %v2042_v20 = vunpack.i.l.bf16 %v2041_v30 }
 0xbe0   : > { %v1087_v7 = vpack.c.bf16 %v1085_v5, %v1085_v5  ;;  %v1209_v29 = vsel %vm308_vm4, %v2559_v17, %v2042_v20  ;;  %v1212_v5 = vsel %vm81_vm0, %v1210_v34, %v2048_v14 }
 0xbe1   : > { %v2085_v8 = vpop.eup %2084 }
 0xbe2   : > { %v1086_v10 = vmul.f32 %v2085_v8, %v2081_v21  ;;  %1935 = vmatmul.mubr.msk.bf16.vlgmr.msra.gmra.mrb[28].mxu1 %vm308_vm4, %v1087_v7  ;;  %v2047_v21 = vunpack.i.l.bf16 %v2046_v32 }
 0xbe3   : > { %1948 = vmatprep.mubr.msk.bf16.mxu1 %vm2153_vm2, %v2152_v12  ;;  %1945 = vmatpush3.bf16.msra.mxu1 %v1757_v11 }
 0xbe4   : > { %v1088_v23 = vpack.c.bf16 %v1086_v10, %v1086_v10  ;;  %1946 = vmatprep.subr.bf16.mxu1 %v2152_v12  ;;  %v1211_v4 = vsel %vm81_vm0, %v1209_v29, %v2047_v21  ;;  %v1764_v21 = vcombine.low %v2399_v54, %v2404_v55 }
 0xbe6   : > { %1941 = vmatmul.mubr.msk.bf16.vlgmr.msra.gmra.mrb[32].mxu0 %vm308_vm4, %v1088_v23 }
 0xbe7   : > { %1956 = vmatprep.mubr.msk.bf16.mxu0 %vm2153_vm2, %v2152_v12  ;;  %1947 = vmatpush3.bf16.msra.mxu1 %v1758_v13 }
 0xbe8   : > { %1960 = vmatprep.subr.bf16.mxu1 %v2152_v12 }
 0xcb5   : > { %v1131_v15 = vpop.f32.mrb[28].mxu1 }
 0xcb6   : > { %v1936_v18 = vpop.f32.mrb[29].mxu1 }
 0xcb7   : > { %v1134_v19 = vpop.f32.mrb[30].mxu1 }
 0xcb8   : > { %v1937_v25 = vpop.f32.mrb[31].mxu1 }
 0xcb9   : > { %v1179_v31 = vpop.f32.mrb[32].mxu0 }
 0xcba   : > { %v2049_v26 = vpack.i.bf16 %v1179_v31, %v1131_v15  ;;  %v1942_v27 = vpop.f32.mrb[33].mxu0 }
 0xcbb   : > { %v1182_v35 = vpop.f32.mrb[34].mxu0 }
 0xcbc   : > { %2050 = vrot.lane.b32.xlu0 %v2049_v26, %s2167_s4  ;;  %v1943_v28 = vpop.f32.mrb[35].mxu0 }
 0xd2e   : > { %v2051_v24 = vpop.permute.xlu0 %2050 }
 0xd2f   : > { %v2053_v36 = vunpack.i.h.bf16 %v2051_v24  ;;  %v2052_v37 = vunpack.i.l.bf16 %v2051_v24 }
 0xd31   : > { %v1215_v7 = vsel %vm1213_vm6, %v1212_v5, %v2053_v36  ;;  %v1214_v8 = vsel %vm1213_vm6, %v1211_v4, %v2052_v37 }
 0xd32   : > { %v1216_v10 = vpack.c.bf16 %v1215_v7, %v1214_v8 }
 0xd34   : > { %1949 = vmatmul.mubr.msk.bf16.vlgmr.msra.gmra.mrb[32].mxu1 %vm246_vm3, %v1216_v10 }
 0xd35   : > { %1968 = vmatprep.mubr.msk.bf16.mxu1 %vm2153_vm2, %v2152_v12 }
 0xe07   : > { %v1272_v23 = vpop.f32.mrb[32].mxu1 }
 0xe08   : > { %v1273_v17 = vadd.f32 %v2374_v49, %v1272_v23  ;;  %v1950_v11 = vpop.f32.mrb[33].mxu1 }
 0xe09   : > { %v1275_v13 = vpop.f32.mrb[34].mxu1 }
 0xe0a   : > { %v1276_v22 = vadd.f32 %v2374_v49, %v1275_v13  ;;  %v1951_v15 = vpop.f32.mrb[35].mxu1  ;;  %v1279_v18 = vadd.f32 %v2144_v6, %v1273_v17 }
 0xe0b   : > { %v1767_v15 = vcombine.low %v2414_v57, %v2419_v58 }
 0xe0c   : > { %v1281_v19 = vsel %vm246_vm3, %v1279_v18, 0.0  ;;  %v1280_v25 = vadd.f32 %v2140_v9, %v1276_v22  ;;  %v1763_v9 = vcombine.low %v2389_v52, %v2394_v53 }
 0xe0d   : > { %1282 = vadd.xlane.f32.xlu1 %v1281_v19  ;;  %1961 = vmatpush3.bf16.msra.mxu1 %v1767_v15  ;;  %v1769_v19 = vcombine.low %v2434_v61, %v2439_v62 }
 0xe0e   : > { %v1284_v31 = vsel %vm246_vm3, %v1280_v25, 0.0  ;;  %1953 = vmatpush3.bf16.msra.mxu0 %v1763_v9  ;;  %1962 = vmatprep.subr.bf16.mxu1 %v2152_v12 }
 0xe0f   : > { %1285 = vadd.xlane.f32.xlu0 %v1284_v31  ;;  %1954 = vmatprep.subr.bf16.mxu0 %v2152_v12 }
 0xe12   : > { %1955 = vmatpush3.bf16.msra.mxu0 %v1764_v21 }
 0xe13   :  { %1972 = vmatprep.subr.bf16.mxu0 (%p221_p0), %v2150_v16 }
 0xe9a   : > { %v1283_v26 = vpop.xlane.xlu1 %1282 }
 0xe9b   : > { %v1288_v27 = vmul.f32 0.03125, %v1283_v26 }
 0xe9c   : > { %v1286_v35 = vpop.xlane.xlu0 %1285 }
 0xe9d   : > { %v1290_v28 = vsub.f32 %v1279_v18, %v1288_v27  ;;  %v1289_v30 = vmul.f32 0.03125, %v1286_v35  ;;  %v1768_v18 = vcombine.low %v2424_v59, %v2429_v60 }
 0xe9f   : > { %v1291_v32 = vsub.f32 %v1280_v25, %v1289_v30  ;;  %v1292_v33 = vmul.f32 %v1290_v28, %v1290_v28  ;;  %1963 = vmatpush3.bf16.msra.mxu1 %v1768_v18  ;;  %v1770_v25 = vcombine.low %v2444_v63, %v2449_v0 }
 0xea0   : > { %1964 = vmatprep.subr.bf16.mxu1 %v2152_v12 }
 0xea1   : > { %v1294_v20 = vsel %vm246_vm3, %v1292_v33, 0.0  ;;  %v1293_v14 = vmul.f32 %v1291_v32, %v1291_v32 }
 0xea2   : > { %1295 = vadd.xlane.f32.xlu0 %v1294_v20 }
 0xea3   : > { %v1297_v6 = vsel %vm246_vm3, %v1293_v14, 0.0  ;;  %1965 = vmatpush3.bf16.msra.mxu1 %v1769_v19 }
 0xea4   : > { %1298 = vadd.xlane.f32.xlu1 %v1297_v6  ;;  %1966 = vmatprep.subr.bf16.mxu1 %v2152_v12 }
 0xea7   : > { %1967 = vmatpush3.bf16.msra.mxu1 %v1770_v25 }
 0xea8   :  { %1987 = vmatprep.subr.bf16.mxu1 (%p221_p0), %v2168_v44 }
 0xf2f   : > { %v1296_v24 = vpop.xlane.xlu0 %1295 }
 0xf30   : > { %v1300_v29 = vmul.f32 0.03125, %v1296_v24 }
 0xf31   : > { %v1299_v34 = vpop.xlane.xlu1 %1298 }
 0xf32   : > { %v1302_v36 = vadd.f32 1e-12, %v1300_v29  ;;  %v1301_v37 = vmul.f32 0.03125, %v1299_v34 }
 0xf34   : > { %2086 = vrsqrt.f32 %v1302_v36  ;;  %v1303_v4 = vadd.f32 1e-12, %v1301_v37 }
 0xf36   : > { %2088 = vrsqrt.f32 %v1303_v4 }
 0xf3e   : > { %v2087_v5 = vpop.eup %2086 }
 0xf3f   : > { %v1306_v7 = vmul.f32 %v2087_v5, %v1290_v28 }
 0xf40   : > { %v2089_v8 = vpop.eup %2088 }
 0xf41   : > { %v1314_v10 = vmul.f32 %v2379_v50, %v1306_v7  ;;  %v1307_v23 = vmul.f32 %v2089_v8, %v1291_v32 }
 0xf43   : > { %v1315_v17 = vmul.f32 %v2379_v50, %v1307_v23  ;;  %v1322_v11 = vadd.f32 %v2384_v51, %v1314_v10 }
 0xf45   : > { %v1323_v13 = vadd.f32 %v2384_v51, %v1315_v17 }
 0xf47   : > { %v1324_v22 = vpack.c.bf16 %v1323_v13, %v1322_v11 }
 0xf49   : > { %1957 = vmatmul.mubr.msk.bf16.vlgmr.msra.gmra.mrb[36].mxu0 %vm246_vm3, %v1324_v22 }
 0xf4a   :  { %1976 = vmatprep.mubr.msk.bf16.mxu0 (%p221_p0), %vm2151_vm1, %v2150_v16 }
0x101c   : > { %v1380_v31 = vpop.f32.mrb[36].mxu0 }
0x101d   : > { %v1381_v26 = vadd.f32 %v2409_v56, %v1380_v31  ;;  %v1958_v27 = vpop.f32.mrb[37].mxu0 }
0x101e   : > { %v1383_v35 = vpop.f32.mrb[38].mxu0 }
0x101f   : > { %v1389_v28 = vmul.f32 0.044715, %v1381_v26  ;;  %v1384_v30 = vadd.f32 %v2409_v56, %v1383_v35  ;;  %v1959_v32 = vpop.f32.mrb[39].mxu0  ;;  %v1387_v4 = vmul.f32 0.5, %v1381_v26 }
0x1021   : > { %v1391_v33 = vmul.f32 %v1389_v28, %v1381_v26  ;;  %v1390_v20 = vmul.f32 0.044715, %v1384_v30  ;;  %v1388_v5 = vmul.f32 0.5, %v1384_v30 }
0x1023   : > { %v1393_v14 = vmul.f32 %v1391_v33, %v1381_v26  ;;  %v1392_v6 = vmul.f32 %v1390_v20, %v1384_v30 }
0x1025   : > { %v1395_v9 = vadd.f32 %v1393_v14, %v1381_v26  ;;  %v1394_v21 = vmul.f32 %v1392_v6, %v1384_v30 }
0x1027   : > { %v1397_v24 = vmul.f32 0.7978846, %v1395_v9  ;;  %v1396_v29 = vadd.f32 %v1394_v21, %v1384_v30 }
0x1029   : > { %2090 = vtanh.f32 %v1397_v24  ;;  %v1398_v12 = vmul.f32 0.7978846, %v1396_v29 }
0x102b   : > { %2092 = vtanh.f32 %v1398_v12 }
0x1033   : > { %v2091_v34 = vpop.eup %2090 }
0x1034   : > { %v1401_v36 = vadd.f32 1.0, %v2091_v34 }
0x1035   : > { %v2093_v37 = vpop.eup %2092 }
0x1036   : > { %v1402_v7 = vadd.f32 1.0, %v2093_v37  ;;  %v1403_v8 = vmul.f32 %v1401_v36, %v1387_v4 }
0x1038   : > { %v1404_v10 = vmul.f32 %v1402_v7, %v1388_v5 }
0x103a   : > { %v1405_v23 = vpack.c.bf16 %v1404_v10, %v1403_v8 }
0x103c   : > { %1969 = vmatmul.mubr.msk.bf16.vlgmr.msra.gmra.mrb[36].mxu1 %vm1436_vm7, %v1405_v23 }
0x103d   :  { %1984 = vmatprep.mubr.msk.f32.mxu1 (%p221_p0), %vm2151_vm1, %v2150_v16  ;;  %1989 = vmatpush3.bf16.msra.mxu1 (%p221_p0), %v1988_v45 }
0x110f   : > { %v1474_v17 = vpop.f32.mrb[36].mxu1 }
0x1110   : > { %v1475_v22 = vadd.f32 %v2454_v1, %v1474_v17  ;;  %v1970_v15 = vpop.f32.mrb[37].mxu1 }
0x1111   : > { %v1477_v18 = vpop.f32.mrb[38].mxu1 }
0x1112   : > { %v1478_v19 = vadd.f32 %v2454_v1, %v1477_v18  ;;  %v1971_v25 = vpop.f32.mrb[39].mxu1  ;;  %v1481_v31 = vadd.f32 %v1475_v22, %v1322_v11  ;;  %v2098_v22 = vld [vmem:[%s2775_s18] sm:$0xff] (%p221_p0)  }
0x1113   :  { %1973 = vmatpush3.bf16.msra.mxu0 (%p221_p0), %v2098_v22 }
0x1114   : > { %v1483_v27 = vsel %vm246_vm3, %v1481_v31, 0.0  ;;  %v1482_v35 = vadd.f32 %v1478_v19, %v1323_v13  ;;  %v2099_v19 = vld [vmem:[%s2775_s18 + $0x8] sm:$0xff] (%p221_p0)   ;;  %1974 = vmatprep.subr.bf16.mxu0 (%p221_p0), %v2150_v16  ;;  %v1774_v16 = vld [vmem:[%s2776_s19] ss:$0 sm:$0xff] (%p221_p0)  ;;  %s2169_s19 = smov (%p221_p0), [#allocation3]  }
0x1115   : > { %1484 = vadd.xlane.f32.xlu0 %v1483_v27  ;;  %s1708_s20 = sshll.u32 (%p221_p0), %s2169_s19, 4  ;;  %s1709_s20 = int_to_ptr.vmem [resolvable:$true] %s1708_s20 }
0x1116   : > { %v1486_v26 = vsel %vm246_vm3, %v1482_v35, 0.0  ;;  %s2102_s26 = scalar_lea.vmem (%p221_p0), %s1709_s20, 32  ;;  %p2107_p2 = scmp.lt.s32.totalorder (%p221_p0), %s1709_s20, %s1709_s20 }
0x1117   : > { %1487 = vadd.xlane.f32.xlu1 %v1486_v26  ;;  %1975 = vmatpush3.bf16.msra.mxu0 (%p221_p0), %v2099_v19  ;;  %p2103_p1 = scmp.ne.s32.totalorder (%p221_p0), %s1709_s20, %s2102_s26  ;;  %p2108_p3 = scmp.lt.s32.totalorder (%p221_p0), %s2102_s26, %s2102_s26 }
0x1119   :  { %p2109_p4 = por (%p221_p0), %p2108_p3, %p2107_p2 }
0x111b   :  { %p2110_p5 = pnand (%p221_p0), %p2109_p4, %p2103_p1 }
0x11a2   : > { %v1485_v28 = vpop.xlane.xlu0 %1484 }
0x11a3   : > { %v1489_v30 = vmul.f32 0.03125, %v1485_v28 }
0x11a4   : > { %v1488_v32 = vpop.xlane.xlu1 %1487 }
0x11a5   : > { %v1491_v33 = vsub.f32 %v1481_v31, %v1489_v30  ;;  %v1490_v20 = vmul.f32 0.03125, %v1488_v32 }
0x11a7   : > { %v1492_v14 = vsub.f32 %v1482_v35, %v1490_v20  ;;  %v1493_v6 = vmul.f32 %v1491_v33, %v1491_v33 }
0x11a9   : > { %v1495_v9 = vsel %vm246_vm3, %v1493_v6, 0.0  ;;  %v1494_v21 = vmul.f32 %v1492_v14, %v1492_v14 }
0x11aa   : > { %1496 = vadd.xlane.f32.xlu0 %v1495_v9 }
0x11ab   : > { %v1498_v11 = vsel %vm246_vm3, %v1494_v21, 0.0 }
0x11ac   : > { %1499 = vadd.xlane.f32.xlu1 %v1498_v11 }
0x1237   : > { %v1497_v24 = vpop.xlane.xlu0 %1496 }
0x1238   : > { %v1501_v13 = vmul.f32 0.03125, %v1497_v24 }
0x1239   : > { %v1500_v29 = vpop.xlane.xlu1 %1499 }
0x123a   : > { %v1503_v12 = vadd.f32 1e-12, %v1501_v13  ;;  %v1502_v34 = vmul.f32 0.03125, %v1500_v29 }
0x123c   : > { %2094 = vrsqrt.f32 %v1503_v12  ;;  %v1504_v36 = vadd.f32 1e-12, %v1502_v34 }
0x123e   : > { %2096 = vrsqrt.f32 %v1504_v36 }
0x1246   : > { %v2095_v37 = vpop.eup %2094 }
0x1247   : > { %v1507_v4 = vmul.f32 %v2095_v37, %v1491_v33 }
0x1248   : > { %v2097_v5 = vpop.eup %2096 }
0x1249   : > { %v1515_v7 = vmul.f32 %v2459_v2, %v1507_v4  ;;  %v1508_v8 = vmul.f32 %v2097_v5, %v1492_v14  ;;  %223 = sbr.rel (!%p221_p0) target bundleno = 550 (0x226), region = 123 }
0x124b   : > { %v1523_v10 = vadd.f32 %v2464_v3, %v1515_v7   ;;  %v1516_v23 = vmul.f32 %v2459_v2, %v1508_v8 }
0x124d   : > { %v1524_v17 = vadd.f32 %v2464_v3, %v1516_v23   ;;  %v2801_v6 = vmov %v1523_v10  ;;  %v1537_v15 = vpack.c.bf16 (%p221_p0), %v1523_v10, %v1523_v10 }
0x124f   : > { %v2800_v9 = vmov %v1524_v17  ;;  %v1538_v18 = vpack.c.bf16 (%p221_p0), %v1524_v17, %v1524_v17  ;;  %v1548_v25 = vunpack.c.l.b16 (%p221_p0), %v1537_v15  ;;  %v1527_v60 = vrot.slane (%p221_p0), %v1524_v17, 7 }
0x1251   :  { %v1549_v38 = vunpack.c.l.b16 %v1538_v18  ;;  %v1529_v61 = vsel %vm1528_vm8, %v1527_v60, %v1523_v10 }
0x1252   :  { %1532 = vst.msk [vmem:[#allocation3] sm:$0x3] %vm1531_vm9, %v1529_v61 }
0x1253   :  { %v1550_v39 = vrot.slane %v1549_v38, 7 }
0x1255   :  { %v1551_v40 = vsel %vm1528_vm8, %v1550_v39, %v1548_v25 }
0x1256   :  { %v1552_v41 = vpack.c.b16 %v1551_v40, %v1551_v40 }
0x1258   :  { %1977 = vmatmul.mubr.msk.bf16.vlgmr.msra.gmra.mrb[0].mxu0 %vm246_vm3, %v1552_v41 }
0x132b   :  { %v1603_v46 = vpop.f32.mrb[0].mxu0 }
0x132c   :  { %v1604_v47 = vadd.f32 %v1774_v16, %v1603_v46  ;;  %v1978_v48 = vpop.f32.mrb[1].mxu0 }
0x132d   :  { %v1606_v49 = vpop.f32.mrb[2].mxu0 }
0x132e   :  { %v1610_v50 = vmul.f32 0.044715, %v1604_v47  ;;  %v1979_v51 = vpop.f32.mrb[3].mxu0  ;;  %v1609_v57 = vmul.f32 0.5, %v1604_v47 }
0x1330   :  { %v1611_v52 = vmul.f32 %v1610_v50, %v1604_v47 }
0x1332   :  { %v1612_v53 = vmul.f32 %v1611_v52, %v1604_v47 }
0x1334   :  { %v1613_v54 = vadd.f32 %v1612_v53, %v1604_v47 }
0x1336   :  { %v1614_v55 = vmul.f32 0.7978846, %v1613_v54 }
0x1338   :  { %2100 = vtanh.f32 %v1614_v55 }
0x1342   :  { %v2101_v56 = vpop.eup %2100 }
0x1343   :  { %v1616_v58 = vadd.f32 1.0, %v2101_v56 }
0x1345   :  { %v1617_v59 = vmul.f32 %v1616_v58, %v1609_v57 }
0x1347   :  { %1985 = vmatmul.mubr.msk.f32.vlgmr.msra.gmra.mrb[0].mxu1 %vm81_vm0, %v1617_v59 }
0x1348   :  { %2113 = shalt.err (!%p2110_p5)
}
0x1349   :  { %s2114_s15 = scalar_lea.hbm %s2779_s22, 32 }
0x134a   :  { %p2115_p6 = scmp.ne.s32.totalorder %s2779_s22, %s2114_s15  ;;  %p2118_p7 = scmp.lt.u32.totalorder %s2114_s15, %s2779_s22 }
0x134c   :  { %p2120_p8 = pnand %p2118_p7, %p2115_p6 }
0x134e   :  { %2123 = shalt.err (!%p2120_p8)
}
0x134f   :  { %1711 = dma.vmem_to_hbm [thread:$0]  %s1709_s20, 32, %s2779_s22, [#allocation4]   ;;  %v1778_v62 = vld [vmem:[#allocation2] ss:$0 sm:$0xff]  ;;  %vm1700_vm10 = vcmask 1024  }
0x141a   :  { %v1696_v63 = vpop.f32.mrb[0].mxu1 }
0x141b   :  { %v1697_v0 = vadd.f32 %v1778_v62, %v1696_v63  ;;  %v1986_v1 = vpop.f32.mrb[1].mxu1 }
0x141d   :  { %1701 = vst.msk [vmem:[%s2780_s23] sm:$0x3] %vm1700_vm10, %v1697_v0 }
0x141e   :  { %2136 = dma.done.wait [#allocation4], 32  }
0x141f   :  { %2137 = vsyncadd [#allocation4], 4294967264 }
0x1420   :  { %1719 = vsyncpa [#allocation4], 1 }

</bundles_post_ra>
